<compile_context>
chip_gen: v6e
topology: v6e:2x2x1
jax: 0.10.0
libtpu: 0.0.40
codegen_flags: <defaults>
</compile_context>

<pallas_src>
import numpy as np

import jax
import jax.numpy as jnp
from jax.experimental import pallas as pl
from jax.experimental.pallas import tpu as pltpu


# (kernel_size, n_pool_offsets_per_dim, activation) per layer, forward order.
_LAYER_CFG = (
    (3, 2, "relu"),     # encoder1: Conv2d(1,16,3,s=3,p=1) + ReLU + maxpool 2x2 s2
    (3, 2, "relu"),     # encoder2: Conv2d(16,8,3,s=2,p=1) + ReLU + maxpool 2x2 s1
    (3, 1, "relu"),     # decoder1: ConvTranspose2d(8,16,3,s=2) + ReLU
    (5, 1, "relu"),     # decoder2: ConvTranspose2d(16,8,5,s=3,p=1) + ReLU
    (2, 1, "sigmoid"),  # out:      ConvTranspose2d(8,1,2,s=2,p=1) + sigmoid
)


def _fused_ae_kernel(x_ref, *refs):
    """Entire CNN_AE forward.  refs = (r1, m1, b1, ..., r5, m5, b5, out_ref)."""
    out_ref = refs[-1]
    h = x_ref[...]                                       # (N*28, 28) f32
    for li, (k, npool, act) in enumerate(_LAYER_CFG):
        r_ref = refs[3 * li]                             # (npool*k, N*OH, N*Hin)
        m_ref = refs[3 * li + 1]                         # (npool*k, Win*Cin, OW*Cout)
        b_ref = refs[3 * li + 2]                         # (1, OW*Cout)
        best = None
        for da in range(npool):
            # Row-gather all k taps for this pool-row offset (shared across db).
            ys = [
                jnp.dot(r_ref[da * k + kh], h, preferred_element_type=jnp.float32)
                for kh in range(k)
            ]
            for db in range(npool):
                s = None
                for kh in range(k):
                    t = jnp.dot(ys[kh], m_ref[db * k + kh],
                                preferred_element_type=jnp.float32)
                    s = t if s is None else s + t
                best = s if best is None else jnp.maximum(best, s)
        z = best + b_ref[...]
        h = jax.nn.sigmoid(z) if act == "sigmoid" else jnp.maximum(z, 0.0)
    out_ref[...] = h.astype(out_ref.dtype)


def _run_fused(x2, tables):
    vmem = pl.BlockSpec(memory_space=pltpu.MemorySpace.VMEM)
    return pl.pallas_call(
        _fused_ae_kernel,
        out_shape=jax.ShapeDtypeStruct((x2.shape[0], 28), jnp.float32),
        in_specs=[vmem] * (1 + len(tables)),
        out_specs=vmem,
    )(x2, *tables)


def cnn_ae_forward(prep, x_nchw):
    n = x_nchw.shape[0]
    x2 = x_nchw.astype(jnp.float32).reshape(n * 28, 28)
    out2 = _run_fused(x2, prep)
    # TODO(synk): if batch ever grows large, add a grid over the row (batch*H)
    # dimension with BlockSpec tiling + dimension_semantics=("parallel",).
    return out2.reshape(n, 1, 28, 28)


# ----------------------------------------------------------------------------
# Host-side, one-time table construction (the "pre-pad / hoist weights" step).
# ----------------------------------------------------------------------------
def _src_index(out_pos, tap, stride, padding, in_size, transposed):
    """Input row/col feeding output position `out_pos` through kernel tap `tap`."""
    if not transposed:
        h = stride * out_pos + tap - padding
    else:
        t = out_pos + padding - tap
        if t % stride != 0:
            return None
        h = t // stride
    return h if 0 <= h < in_size else None


def _build_layer_tables(w, bias, *, transposed, hin, win, cin, cout, k, stride,
                        padding, pool_k, pool_s, batch):
    w = np.asarray(w, np.float32)
    bias = np.asarray(bias, np.float32)
    if transposed:
        wt = np.transpose(w, (2, 3, 0, 1))               # (kh,kw,Cin,Cout) from (Cin,Cout,kh,kw)
        hc = (hin - 1) * stride + k - 2 * padding
        wc = (win - 1) * stride + k - 2 * padding
    else:
        wt = np.transpose(w, (2, 3, 1, 0))               # (kh,kw,Cin,Cout) from (Cout,Cin,kh,kw)
        hc = (hin + 2 * padding - k) // stride + 1
        wc = (win + 2 * padding - k) // stride + 1
    oh = (hc - pool_k) // pool_s + 1
    ow = (wc - pool_k) // pool_s + 1

    # Row-selection tables (block-diagonal over the batch).
    r = np.zeros((pool_k * k, batch * oh, batch * hin), np.float32)
    for da in range(pool_k):
        for kh in range(k):
            for a in range(oh):
                i = pool_s * a + da
                if i >= hc:
                    continue
                h = _src_index(i, kh, stride, padding, hin, transposed)
                if h is None:
                    continue
                for n in range(batch):
                    r[da * k + kh, n * oh + a, n * hin + h] = 1.0

    # Weight-embedded column tables (column order: (w, c) -> (ow, cout)).
    m = np.zeros((pool_k * k, win * cin, ow * cout), np.float32)
    for db in range(pool_k):
        for kh in range(k):
            for b_out in range(ow):
                j = pool_s * b_out + db
                if j >= wc:
                    continue
                for kw in range(k):
                    wsrc = _src_index(j, kw, stride, padding, win, transposed)
                    if wsrc is None:
                        continue
                    m[db * k + kh,
                      wsrc * cin:(wsrc + 1) * cin,
                      b_out * cout:(b_out + 1) * cout] += wt[kh, kw]

    brow = np.tile(bias, ow).reshape(1, ow * cout)
    return jnp.asarray(r), jnp.asarray(m), jnp.asarray(brow)


def prepare(params, batch):
    cfgs = [
        dict(w=params["e1_w"], bias=params["e1_b"], transposed=False,
             hin=28, win=28, cin=1, cout=16, k=3, stride=3, padding=1,
             pool_k=2, pool_s=2),
        dict(w=params["e2_w"], bias=params["e2_b"], transposed=False,
             hin=5, win=5, cin=16, cout=8, k=3, stride=2, padding=1,
             pool_k=2, pool_s=1),
        dict(w=params["d1_w"], bias=params["d1_b"], transposed=True,
             hin=2, win=2, cin=8, cout=16, k=3, stride=2, padding=0,
             pool_k=1, pool_s=1),
        dict(w=params["d2_w"], bias=params["d2_b"], transposed=True,
             hin=5, win=5, cin=16, cout=8, k=5, stride=3, padding=1,
             pool_k=1, pool_s=1),
        dict(w=params["o_w"], bias=params["o_b"], transposed=True,
             hin=15, win=15, cin=8, cout=1, k=2, stride=2, padding=1,
             pool_k=1, pool_s=1),
    ]
    tables = []
    for cfg in cfgs:
        tables.extend(_build_layer_tables(batch=batch, **cfg))
    return tuple(tables)


# ----------------------------------------------------------------------------
# Pure-JAX reference (XLA convs) used only for an in-script correctness check.
# ----------------------------------------------------------------------------
def _reference_forward(params, x):
    def conv(x, w, b, stride, padding):
        y = jax.lax.conv_general_dilated(
            x, w, window_strides=(stride, stride),
            padding=[(padding, padding), (padding, padding)],
            dimension_numbers=("NCHW", "OIHW", "NCHW"))
        return y + b.reshape(1, -1, 1, 1)

    def conv_t(x, w, b, stride, padding):
        k = w.shape[2]
        w_flip = jnp.transpose(w, (1, 0, 2, 3))[:, :, ::-1, ::-1]
        y = jax.lax.conv_general_dilated(
            x, w_flip, window_strides=(1, 1),
            padding=[(k - 1 - padding, k - 1 - padding)] * 2,
            lhs_dilation=(stride, stride),
            dimension_numbers=("NCHW", "OIHW", "NCHW"))
        return y + b.reshape(1, -1, 1, 1)

    def maxpool(x, k, s):
        return jax.lax.reduce_window(x, -jnp.inf, jax.lax.max,
                                     (1, 1, k, k), (1, 1, s, s), "VALID")

    h = maxpool(jax.nn.relu(conv(x, params["e1_w"], params["e1_b"], 3, 1)), 2, 2)
    h = maxpool(jax.nn.relu(conv(h, params["e2_w"], params["e2_b"], 2, 1)), 2, 1)
    h = jax.nn.relu(conv_t(h, params["d1_w"], params["d1_b"], 2, 0))
    h = jax.nn.relu(conv_t(h, params["d2_w"], params["d2_b"], 3, 1))
    return jax.nn.sigmoid(conv_t(h, params["o_w"], params["o_b"], 2, 1))


def init_params(key):
    # Deterministic PyTorch-style uniform init (bound = 1/sqrt(fan_in)).
    # TODO(synk): RMSprop optimizer / MSELoss / .to(device) in __init__ are
    # training-time state, not part of forward; omitted.
    def uinit(k, shape, fan_in):
        bound = 1.0 / (fan_in ** 0.5)
        return jax.random.uniform(k, shape, jnp.float32, -bound, bound)

    ks = jax.random.split(key, 10)
    return {
        "e1_w": uinit(ks[0], (16, 1, 3, 3), 1 * 9),   "e1_b": uinit(ks[1], (16,), 1 * 9),
        "e2_w": uinit(ks[2], (8, 16, 3, 3), 16 * 9),  "e2_b": uinit(ks[3], (8,), 16 * 9),
        "d1_w": uinit(ks[4], (8, 16, 3, 3), 8 * 9),   "d1_b": uinit(ks[5], (16,), 8 * 9),
        "d2_w": uinit(ks[6], (16, 8, 5, 5), 16 * 25), "d2_b": uinit(ks[7], (8,), 16 * 25),
        "o_w":  uinit(ks[8], (8, 1, 2, 2), 8 * 4),    "o_b":  uinit(ks[9], (1,), 8 * 4),
    }


if __name__ == "__main__":
    key = jax.random.PRNGKey(0)
    pkey, xkey = jax.random.split(key)
    params = init_params(pkey)
    x = jax.random.uniform(xkey, (2, 1, 28, 28), jnp.float32)

    prep = prepare(params, batch=2)                      # one-time weight prep
    fwd = jax.jit(cnn_ae_forward)
    out = jax.block_until_ready(fwd(prep, x))

    assert out.shape == (2, 1, 28, 28), out.shape
    assert bool(jnp.all((out >= 0.0) & (out <= 1.0)))

    ref = jax.block_until_ready(_reference_forward(params, x))
    max_err = float(jnp.max(jnp.abs(out - ref)))
    assert max_err < 2e-2, f"mismatch vs reference: max_err={max_err}"

    print("KERNEL_OK")
</pallas_src>

<mosaic_0001>
module attributes {stable_mosaic.version = 11 : i64} {
  func.func @_fused_ae_kernel(%arg0: memref<56x28xf32, #tpu.memory_space<vmem>>, %arg1: memref<6x10x56xf32, #tpu.memory_space<vmem>>, %arg2: memref<6x28x80xf32, #tpu.memory_space<vmem>>, %arg3: memref<1x80xf32, #tpu.memory_space<vmem>>, %arg4: memref<6x4x10xf32, #tpu.memory_space<vmem>>, %arg5: memref<6x80x16xf32, #tpu.memory_space<vmem>>, %arg6: memref<1x16xf32, #tpu.memory_space<vmem>>, %arg7: memref<3x10x4xf32, #tpu.memory_space<vmem>>, %arg8: memref<3x16x80xf32, #tpu.memory_space<vmem>>, %arg9: memref<1x80xf32, #tpu.memory_space<vmem>>, %arg10: memref<5x30x10xf32, #tpu.memory_space<vmem>>, %arg11: memref<5x80x120xf32, #tpu.memory_space<vmem>>, %arg12: memref<1x120xf32, #tpu.memory_space<vmem>>, %arg13: memref<2x56x30xf32, #tpu.memory_space<vmem>>, %arg14: memref<2x120x28xf32, #tpu.memory_space<vmem>>, %arg15: memref<1x28xf32, #tpu.memory_space<vmem>>, %arg16: memref<56x28xf32, #tpu.memory_space<vmem>>) attributes {dimension_semantics = [], scalar_prefetch = 0 : i64, scratch_operands = 0 : i64, tpu.core_type = #tpu.core_type<tc>} {
    %c0 = arith.constant 0 : index
    %c0_0 = arith.constant 0 : index
    %0 = vector.load %arg0[%c0, %c0_0] : memref<56x28xf32, #tpu.memory_space<vmem>>, vector<56x28xf32>
    %c0_1 = arith.constant 0 : index
    %c0_2 = arith.constant 0 : index
    %c0_3 = arith.constant 0 : index
    %1 = vector.load %arg1[%c0_1, %c0_2, %c0_3] : memref<6x10x56xf32, #tpu.memory_space<vmem>>, vector<1x10x56xf32>
    %2 = vector.shape_cast %1 : vector<1x10x56xf32> to vector<10x56xf32>
    %cst = arith.constant dense<0.000000e+00> : vector<10x28xf32>
    %3 = tpu.matmul %2, %0, %cst {dimension_numbers = #tpu.dot_dimension_numbers<[1], [0], [0], [1], [0, 0, 1, 1], [], []>} : vector<10x56xf32>, vector<56x28xf32>, vector<10x28xf32> -> vector<10x28xf32>
    %c1 = arith.constant 1 : index
    %c0_4 = arith.constant 0 : index
    %c0_5 = arith.constant 0 : index
    %4 = vector.load %arg1[%c1, %c0_4, %c0_5] : memref<6x10x56xf32, #tpu.memory_space<vmem>>, vector<1x10x56xf32>
    %5 = vector.shape_cast %4 : vector<1x10x56xf32> to vector<10x56xf32>
    %cst_6 = arith.constant dense<0.000000e+00> : vector<10x28xf32>
    %6 = tpu.matmul %5, %0, %cst_6 {dimension_numbers = #tpu.dot_dimension_numbers<[1], [0], [0], [1], [0, 0, 1, 1], [], []>} : vector<10x56xf32>, vector<56x28xf32>, vector<10x28xf32> -> vector<10x28xf32>
    %c2 = arith.constant 2 : index
    %c0_7 = arith.constant 0 : index
    %c0_8 = arith.constant 0 : index
    %7 = vector.load %arg1[%c2, %c0_7, %c0_8] : memref<6x10x56xf32, #tpu.memory_space<vmem>>, vector<1x10x56xf32>
    %8 = vector.shape_cast %7 : vector<1x10x56xf32> to vector<10x56xf32>
    %cst_9 = arith.constant dense<0.000000e+00> : vector<10x28xf32>
    %9 = tpu.matmul %8, %0, %cst_9 {dimension_numbers = #tpu.dot_dimension_numbers<[1], [0], [0], [1], [0, 0, 1, 1], [], []>} : vector<10x56xf32>, vector<56x28xf32>, vector<10x28xf32> -> vector<10x28xf32>
    %c0_10 = arith.constant 0 : index
    %c0_11 = arith.constant 0 : index
    %c0_12 = arith.constant 0 : index
    %10 = vector.load %arg2[%c0_10, %c0_11, %c0_12] : memref<6x28x80xf32, #tpu.memory_space<vmem>>, vector<1x28x80xf32>
    %11 = vector.shape_cast %10 : vector<1x28x80xf32> to vector<28x80xf32>
    %cst_13 = arith.constant dense<0.000000e+00> : vector<10x80xf32>
    %12 = tpu.matmul %3, %11, %cst_13 {dimension_numbers = #tpu.dot_dimension_numbers<[1], [0], [0], [1], [0, 0, 1, 1], [], []>} : vector<10x28xf32>, vector<28x80xf32>, vector<10x80xf32> -> vector<10x80xf32>
    %c1_14 = arith.constant 1 : index
    %c0_15 = arith.constant 0 : index
    %c0_16 = arith.constant 0 : index
    %13 = vector.load %arg2[%c1_14, %c0_15, %c0_16] : memref<6x28x80xf32, #tpu.memory_space<vmem>>, vector<1x28x80xf32>
    %14 = vector.shape_cast %13 : vector<1x28x80xf32> to vector<28x80xf32>
    %cst_17 = arith.constant dense<0.000000e+00> : vector<10x80xf32>
    %15 = tpu.matmul %6, %14, %cst_17 {dimension_numbers = #tpu.dot_dimension_numbers<[1], [0], [0], [1], [0, 0, 1, 1], [], []>} : vector<10x28xf32>, vector<28x80xf32>, vector<10x80xf32> -> vector<10x80xf32>
    %16 = arith.addf %12, %15 : vector<10x80xf32>
    %c2_18 = arith.constant 2 : index
    %c0_19 = arith.constant 0 : index
    %c0_20 = arith.constant 0 : index
    %17 = vector.load %arg2[%c2_18, %c0_19, %c0_20] : memref<6x28x80xf32, #tpu.memory_space<vmem>>, vector<1x28x80xf32>
    %18 = vector.shape_cast %17 : vector<1x28x80xf32> to vector<28x80xf32>
    %cst_21 = arith.constant dense<0.000000e+00> : vector<10x80xf32>
    %19 = tpu.matmul %9, %18, %cst_21 {dimension_numbers = #tpu.dot_dimension_numbers<[1], [0], [0], [1], [0, 0, 1, 1], [], []>} : vector<10x28xf32>, vector<28x80xf32>, vector<10x80xf32> -> vector<10x80xf32>
    %20 = arith.addf %16, %19 : vector<10x80xf32>
    %c3 = arith.constant 3 : index
    %c0_22 = arith.constant 0 : index
    %c0_23 = arith.constant 0 : index
    %21 = vector.load %arg2[%c3, %c0_22, %c0_23] : memref<6x28x80xf32, #tpu.memory_space<vmem>>, vector<1x28x80xf32>
    %22 = vector.shape_cast %21 : vector<1x28x80xf32> to vector<28x80xf32>
    %cst_24 = arith.constant dense<0.000000e+00> : vector<10x80xf32>
    %23 = tpu.matmul %3, %22, %cst_24 {dimension_numbers = #tpu.dot_dimension_numbers<[1], [0], [0], [1], [0, 0, 1, 1], [], []>} : vector<10x28xf32>, vector<28x80xf32>, vector<10x80xf32> -> vector<10x80xf32>
    %c4 = arith.constant 4 : index
    %c0_25 = arith.constant 0 : index
    %c0_26 = arith.constant 0 : index
    %24 = vector.load %arg2[%c4, %c0_25, %c0_26] : memref<6x28x80xf32, #tpu.memory_space<vmem>>, vector<1x28x80xf32>
    %25 = vector.shape_cast %24 : vector<1x28x80xf32> to vector<28x80xf32>
    %cst_27 = arith.constant dense<0.000000e+00> : vector<10x80xf32>
    %26 = tpu.matmul %6, %25, %cst_27 {dimension_numbers = #tpu.dot_dimension_numbers<[1], [0], [0], [1], [0, 0, 1, 1], [], []>} : vector<10x28xf32>, vector<28x80xf32>, vector<10x80xf32> -> vector<10x80xf32>
    %27 = arith.addf %23, %26 : vector<10x80xf32>
    %c5 = arith.constant 5 : index
    %c0_28 = arith.constant 0 : index
    %c0_29 = arith.constant 0 : index
    %28 = vector.load %arg2[%c5, %c0_28, %c0_29] : memref<6x28x80xf32, #tpu.memory_space<vmem>>, vector<1x28x80xf32>
    %29 = vector.shape_cast %28 : vector<1x28x80xf32> to vector<28x80xf32>
    %cst_30 = arith.constant dense<0.000000e+00> : vector<10x80xf32>
    %30 = tpu.matmul %9, %29, %cst_30 {dimension_numbers = #tpu.dot_dimension_numbers<[1], [0], [0], [1], [0, 0, 1, 1], [], []>} : vector<10x28xf32>, vector<28x80xf32>, vector<10x80xf32> -> vector<10x80xf32>
    %31 = arith.addf %27, %30 : vector<10x80xf32>
    %32 = arith.maximumf %20, %31 : vector<10x80xf32>
    %c3_31 = arith.constant 3 : index
    %c0_32 = arith.constant 0 : index
    %c0_33 = arith.constant 0 : index
    %33 = vector.load %arg1[%c3_31, %c0_32, %c0_33] : memref<6x10x56xf32, #tpu.memory_space<vmem>>, vector<1x10x56xf32>
    %34 = vector.shape_cast %33 : vector<1x10x56xf32> to vector<10x56xf32>
    %cst_34 = arith.constant dense<0.000000e+00> : vector<10x28xf32>
    %35 = tpu.matmul %34, %0, %cst_34 {dimension_numbers = #tpu.dot_dimension_numbers<[1], [0], [0], [1], [0, 0, 1, 1], [], []>} : vector<10x56xf32>, vector<56x28xf32>, vector<10x28xf32> -> vector<10x28xf32>
    %c4_35 = arith.constant 4 : index
    %c0_36 = arith.constant 0 : index
    %c0_37 = arith.constant 0 : index
    %36 = vector.load %arg1[%c4_35, %c0_36, %c0_37] : memref<6x10x56xf32, #tpu.memory_space<vmem>>, vector<1x10x56xf32>
    %37 = vector.shape_cast %36 : vector<1x10x56xf32> to vector<10x56xf32>
    %cst_38 = arith.constant dense<0.000000e+00> : vector<10x28xf32>
    %38 = tpu.matmul %37, %0, %cst_38 {dimension_numbers = #tpu.dot_dimension_numbers<[1], [0], [0], [1], [0, 0, 1, 1], [], []>} : vector<10x56xf32>, vector<56x28xf32>, vector<10x28xf32> -> vector<10x28xf32>
    %c5_39 = arith.constant 5 : index
    %c0_40 = arith.constant 0 : index
    %c0_41 = arith.constant 0 : index
    %39 = vector.load %arg1[%c5_39, %c0_40, %c0_41] : memref<6x10x56xf32, #tpu.memory_space<vmem>>, vector<1x10x56xf32>
    %40 = vector.shape_cast %39 : vector<1x10x56xf32> to vector<10x56xf32>
    %cst_42 = arith.constant dense<0.000000e+00> : vector<10x28xf32>
    %41 = tpu.matmul %40, %0, %cst_42 {dimension_numbers = #tpu.dot_dimension_numbers<[1], [0], [0], [1], [0, 0, 1, 1], [], []>} : vector<10x56xf32>, vector<56x28xf32>, vector<10x28xf32> -> vector<10x28xf32>
    %c0_43 = arith.constant 0 : index
    %c0_44 = arith.constant 0 : index
    %c0_45 = arith.constant 0 : index
    %42 = vector.load %arg2[%c0_43, %c0_44, %c0_45] : memref<6x28x80xf32, #tpu.memory_space<vmem>>, vector<1x28x80xf32>
    %43 = vector.shape_cast %42 : vector<1x28x80xf32> to vector<28x80xf32>
    %cst_46 = arith.constant dense<0.000000e+00> : vector<10x80xf32>
    %44 = tpu.matmul %35, %43, %cst_46 {dimension_numbers = #tpu.dot_dimension_numbers<[1], [0], [0], [1], [0, 0, 1, 1], [], []>} : vector<10x28xf32>, vector<28x80xf32>, vector<10x80xf32> -> vector<10x80xf32>
    %c1_47 = arith.constant 1 : index
    %c0_48 = arith.constant 0 : index
    %c0_49 = arith.constant 0 : index
    %45 = vector.load %arg2[%c1_47, %c0_48, %c0_49] : memref<6x28x80xf32, #tpu.memory_space<vmem>>, vector<1x28x80xf32>
    %46 = vector.shape_cast %45 : vector<1x28x80xf32> to vector<28x80xf32>
    %cst_50 = arith.constant dense<0.000000e+00> : vector<10x80xf32>
    %47 = tpu.matmul %38, %46, %cst_50 {dimension_numbers = #tpu.dot_dimension_numbers<[1], [0], [0], [1], [0, 0, 1, 1], [], []>} : vector<10x28xf32>, vector<28x80xf32>, vector<10x80xf32> -> vector<10x80xf32>
    %48 = arith.addf %44, %47 : vector<10x80xf32>
    %c2_51 = arith.constant 2 : index
    %c0_52 = arith.constant 0 : index
    %c0_53 = arith.constant 0 : index
    %49 = vector.load %arg2[%c2_51, %c0_52, %c0_53] : memref<6x28x80xf32, #tpu.memory_space<vmem>>, vector<1x28x80xf32>
    %50 = vector.shape_cast %49 : vector<1x28x80xf32> to vector<28x80xf32>
    %cst_54 = arith.constant dense<0.000000e+00> : vector<10x80xf32>
    %51 = tpu.matmul %41, %50, %cst_54 {dimension_numbers = #tpu.dot_dimension_numbers<[1], [0], [0], [1], [0, 0, 1, 1], [], []>} : vector<10x28xf32>, vector<28x80xf32>, vector<10x80xf32> -> vector<10x80xf32>
    %52 = arith.addf %48, %51 : vector<10x80xf32>
    %53 = arith.maximumf %32, %52 : vector<10x80xf32>
    %c3_55 = arith.constant 3 : index
    %c0_56 = arith.constant 0 : index
    %c0_57 = arith.constant 0 : index
    %54 = vector.load %arg2[%c3_55, %c0_56, %c0_57] : memref<6x28x80xf32, #tpu.memory_space<vmem>>, vector<1x28x80xf32>
    %55 = vector.shape_cast %54 : vector<1x28x80xf32> to vector<28x80xf32>
    %cst_58 = arith.constant dense<0.000000e+00> : vector<10x80xf32>
    %56 = tpu.matmul %35, %55, %cst_58 {dimension_numbers = #tpu.dot_dimension_numbers<[1], [0], [0], [1], [0, 0, 1, 1], [], []>} : vector<10x28xf32>, vector<28x80xf32>, vector<10x80xf32> -> vector<10x80xf32>
    %c4_59 = arith.constant 4 : index
    %c0_60 = arith.constant 0 : index
    %c0_61 = arith.constant 0 : index
    %57 = vector.load %arg2[%c4_59, %c0_60, %c0_61] : memref<6x28x80xf32, #tpu.memory_space<vmem>>, vector<1x28x80xf32>
    %58 = vector.shape_cast %57 : vector<1x28x80xf32> to vector<28x80xf32>
    %cst_62 = arith.constant dense<0.000000e+00> : vector<10x80xf32>
    %59 = tpu.matmul %38, %58, %cst_62 {dimension_numbers = #tpu.dot_dimension_numbers<[1], [0], [0], [1], [0, 0, 1, 1], [], []>} : vector<10x28xf32>, vector<28x80xf32>, vector<10x80xf32> -> vector<10x80xf32>
    %60 = arith.addf %56, %59 : vector<10x80xf32>
    %c5_63 = arith.constant 5 : index
    %c0_64 = arith.constant 0 : index
    %c0_65 = arith.constant 0 : index
    %61 = vector.load %arg2[%c5_63, %c0_64, %c0_65] : memref<6x28x80xf32, #tpu.memory_space<vmem>>, vector<1x28x80xf32>
    %62 = vector.shape_cast %61 : vector<1x28x80xf32> to vector<28x80xf32>
    %cst_66 = arith.constant dense<0.000000e+00> : vector<10x80xf32>
    %63 = tpu.matmul %41, %62, %cst_66 {dimension_numbers = #tpu.dot_dimension_numbers<[1], [0], [0], [1], [0, 0, 1, 1], [], []>} : vector<10x28xf32>, vector<28x80xf32>, vector<10x80xf32> -> vector<10x80xf32>
    %64 = arith.addf %60, %63 : vector<10x80xf32>
    %65 = arith.maximumf %53, %64 : vector<10x80xf32>
    %c0_67 = arith.constant 0 : index
    %c0_68 = arith.constant 0 : index
    %66 = vector.load %arg3[%c0_67, %c0_68] : memref<1x80xf32, #tpu.memory_space<vmem>>, vector<1x80xf32>
    %67 = vector.broadcast %66 : vector<1x80xf32> to vector<10x80xf32>
    %68 = arith.addf %65, %67 : vector<10x80xf32>
    %cst_69 = arith.constant 0.000000e+00 : f32
    %69 = vector.broadcast %cst_69 : f32 to vector<10x80xf32>
    %70 = arith.maximumf %68, %69 : vector<10x80xf32>
    %c0_70 = arith.constant 0 : index
    %c0_71 = arith.constant 0 : index
    %c0_72 = arith.constant 0 : index
    %71 = vector.load %arg4[%c0_70, %c0_71, %c0_72] : memref<6x4x10xf32, #tpu.memory_space<vmem>>, vector<1x4x10xf32>
    %72 = vector.shape_cast %71 : vector<1x4x10xf32> to vector<4x10xf32>
    %cst_73 = arith.constant dense<0.000000e+00> : vector<4x80xf32>
    %73 = tpu.matmul %72, %70, %cst_73 {dimension_numbers = #tpu.dot_dimension_numbers<[1], [0], [0], [1], [0, 0, 1, 1], [], []>} : vector<4x10xf32>, vector<10x80xf32>, vector<4x80xf32> -> vector<4x80xf32>
    %c1_74 = arith.constant 1 : index
    %c0_75 = arith.constant 0 : index
    %c0_76 = arith.constant 0 : index
    %74 = vector.load %arg4[%c1_74, %c0_75, %c0_76] : memref<6x4x10xf32, #tpu.memory_space<vmem>>, vector<1x4x10xf32>
    %75 = vector.shape_cast %74 : vector<1x4x10xf32> to vector<4x10xf32>
    %cst_77 = arith.constant dense<0.000000e+00> : vector<4x80xf32>
    %76 = tpu.matmul %75, %70, %cst_77 {dimension_numbers = #tpu.dot_dimension_numbers<[1], [0], [0], [1], [0, 0, 1, 1], [], []>} : vector<4x10xf32>, vector<10x80xf32>, vector<4x80xf32> -> vector<4x80xf32>
    %c2_78 = arith.constant 2 : index
    %c0_79 = arith.constant 0 : index
    %c0_80 = arith.constant 0 : index
    %77 = vector.load %arg4[%c2_78, %c0_79, %c0_80] : memref<6x4x10xf32, #tpu.memory_space<vmem>>, vector<1x4x10xf32>
    %78 = vector.shape_cast %77 : vector<1x4x10xf32> to vector<4x10xf32>
    %cst_81 = arith.constant dense<0.000000e+00> : vector<4x80xf32>
    %79 = tpu.matmul %78, %70, %cst_81 {dimension_numbers = #tpu.dot_dimension_numbers<[1], [0], [0], [1], [0, 0, 1, 1], [], []>} : vector<4x10xf32>, vector<10x80xf32>, vector<4x80xf32> -> vector<4x80xf32>
    %c0_82 = arith.constant 0 : index
    %c0_83 = arith.constant 0 : index
    %c0_84 = arith.constant 0 : index
    %80 = vector.load %arg5[%c0_82, %c0_83, %c0_84] : memref<6x80x16xf32, #tpu.memory_space<vmem>>, vector<1x80x16xf32>
    %81 = vector.shape_cast %80 : vector<1x80x16xf32> to vector<80x16xf32>
    %cst_85 = arith.constant dense<0.000000e+00> : vector<4x16xf32>
    %82 = tpu.matmul %73, %81, %cst_85 {dimension_numbers = #tpu.dot_dimension_numbers<[1], [0], [0], [1], [0, 0, 1, 1], [], []>} : vector<4x80xf32>, vector<80x16xf32>, vector<4x16xf32> -> vector<4x16xf32>
    %c1_86 = arith.constant 1 : index
    %c0_87 = arith.constant 0 : index
    %c0_88 = arith.constant 0 : index
    %83 = vector.load %arg5[%c1_86, %c0_87, %c0_88] : memref<6x80x16xf32, #tpu.memory_space<vmem>>, vector<1x80x16xf32>
    %84 = vector.shape_cast %83 : vector<1x80x16xf32> to vector<80x16xf32>
    %cst_89 = arith.constant dense<0.000000e+00> : vector<4x16xf32>
    %85 = tpu.matmul %76, %84, %cst_89 {dimension_numbers = #tpu.dot_dimension_numbers<[1], [0], [0], [1], [0, 0, 1, 1], [], []>} : vector<4x80xf32>, vector<80x16xf32>, vector<4x16xf32> -> vector<4x16xf32>
    %86 = arith.addf %82, %85 : vector<4x16xf32>
    %c2_90 = arith.constant 2 : index
    %c0_91 = arith.constant 0 : index
    %c0_92 = arith.constant 0 : index
    %87 = vector.load %arg5[%c2_90, %c0_91, %c0_92] : memref<6x80x16xf32, #tpu.memory_space<vmem>>, vector<1x80x16xf32>
    %88 = vector.shape_cast %87 : vector<1x80x16xf32> to vector<80x16xf32>
    %cst_93 = arith.constant dense<0.000000e+00> : vector<4x16xf32>
    %89 = tpu.matmul %79, %88, %cst_93 {dimension_numbers = #tpu.dot_dimension_numbers<[1], [0], [0], [1], [0, 0, 1, 1], [], []>} : vector<4x80xf32>, vector<80x16xf32>, vector<4x16xf32> -> vector<4x16xf32>
    %90 = arith.addf %86, %89 : vector<4x16xf32>
    %c3_94 = arith.constant 3 : index
    %c0_95 = arith.constant 0 : index
    %c0_96 = arith.constant 0 : index
    %91 = vector.load %arg5[%c3_94, %c0_95, %c0_96] : memref<6x80x16xf32, #tpu.memory_space<vmem>>, vector<1x80x16xf32>
    %92 = vector.shape_cast %91 : vector<1x80x16xf32> to vector<80x16xf32>
    %cst_97 = arith.constant dense<0.000000e+00> : vector<4x16xf32>
    %93 = tpu.matmul %73, %92, %cst_97 {dimension_numbers = #tpu.dot_dimension_numbers<[1], [0], [0], [1], [0, 0, 1, 1], [], []>} : vector<4x80xf32>, vector<80x16xf32>, vector<4x16xf32> -> vector<4x16xf32>
    %c4_98 = arith.constant 4 : index
    %c0_99 = arith.constant 0 : index
    %c0_100 = arith.constant 0 : index
    %94 = vector.load %arg5[%c4_98, %c0_99, %c0_100] : memref<6x80x16xf32, #tpu.memory_space<vmem>>, vector<1x80x16xf32>
    %95 = vector.shape_cast %94 : vector<1x80x16xf32> to vector<80x16xf32>
    %cst_101 = arith.constant dense<0.000000e+00> : vector<4x16xf32>
    %96 = tpu.matmul %76, %95, %cst_101 {dimension_numbers = #tpu.dot_dimension_numbers<[1], [0], [0], [1], [0, 0, 1, 1], [], []>} : vector<4x80xf32>, vector<80x16xf32>, vector<4x16xf32> -> vector<4x16xf32>
    %97 = arith.addf %93, %96 : vector<4x16xf32>
    %c5_102 = arith.constant 5 : index
    %c0_103 = arith.constant 0 : index
    %c0_104 = arith.constant 0 : index
    %98 = vector.load %arg5[%c5_102, %c0_103, %c0_104] : memref<6x80x16xf32, #tpu.memory_space<vmem>>, vector<1x80x16xf32>
    %99 = vector.shape_cast %98 : vector<1x80x16xf32> to vector<80x16xf32>
    %cst_105 = arith.constant dense<0.000000e+00> : vector<4x16xf32>
    %100 = tpu.matmul %79, %99, %cst_105 {dimension_numbers = #tpu.dot_dimension_numbers<[1], [0], [0], [1], [0, 0, 1, 1], [], []>} : vector<4x80xf32>, vector<80x16xf32>, vector<4x16xf32> -> vector<4x16xf32>
    %101 = arith.addf %97, %100 : vector<4x16xf32>
    %102 = arith.maximumf %90, %101 : vector<4x16xf32>
    %c3_106 = arith.constant 3 : index
    %c0_107 = arith.constant 0 : index
    %c0_108 = arith.constant 0 : index
    %103 = vector.load %arg4[%c3_106, %c0_107, %c0_108] : memref<6x4x10xf32, #tpu.memory_space<vmem>>, vector<1x4x10xf32>
    %104 = vector.shape_cast %103 : vector<1x4x10xf32> to vector<4x10xf32>
    %cst_109 = arith.constant dense<0.000000e+00> : vector<4x80xf32>
    %105 = tpu.matmul %104, %70, %cst_109 {dimension_numbers = #tpu.dot_dimension_numbers<[1], [0], [0], [1], [0, 0, 1, 1], [], []>} : vector<4x10xf32>, vector<10x80xf32>, vector<4x80xf32> -> vector<4x80xf32>
    %c4_110 = arith.constant 4 : index
    %c0_111 = arith.constant 0 : index
    %c0_112 = arith.constant 0 : index
    %106 = vector.load %arg4[%c4_110, %c0_111, %c0_112] : memref<6x4x10xf32, #tpu.memory_space<vmem>>, vector<1x4x10xf32>
    %107 = vector.shape_cast %106 : vector<1x4x10xf32> to vector<4x10xf32>
    %cst_113 = arith.constant dense<0.000000e+00> : vector<4x80xf32>
    %108 = tpu.matmul %107, %70, %cst_113 {dimension_numbers = #tpu.dot_dimension_numbers<[1], [0], [0], [1], [0, 0, 1, 1], [], []>} : vector<4x10xf32>, vector<10x80xf32>, vector<4x80xf32> -> vector<4x80xf32>
    %c5_114 = arith.constant 5 : index
    %c0_115 = arith.constant 0 : index
    %c0_116 = arith.constant 0 : index
    %109 = vector.load %arg4[%c5_114, %c0_115, %c0_116] : memref<6x4x10xf32, #tpu.memory_space<vmem>>, vector<1x4x10xf32>
    %110 = vector.shape_cast %109 : vector<1x4x10xf32> to vector<4x10xf32>
    %cst_117 = arith.constant dense<0.000000e+00> : vector<4x80xf32>
    %111 = tpu.matmul %110, %70, %cst_117 {dimension_numbers = #tpu.dot_dimension_numbers<[1], [0], [0], [1], [0, 0, 1, 1], [], []>} : vector<4x10xf32>, vector<10x80xf32>, vector<4x80xf32> -> vector<4x80xf32>
    %c0_118 = arith.constant 0 : index
    %c0_119 = arith.constant 0 : index
    %c0_120 = arith.constant 0 : index
    %112 = vector.load %arg5[%c0_118, %c0_119, %c0_120] : memref<6x80x16xf32, #tpu.memory_space<vmem>>, vector<1x80x16xf32>
    %113 = vector.shape_cast %112 : vector<1x80x16xf32> to vector<80x16xf32>
    %cst_121 = arith.constant dense<0.000000e+00> : vector<4x16xf32>
    %114 = tpu.matmul %105, %113, %cst_121 {dimension_numbers = #tpu.dot_dimension_numbers<[1], [0], [0], [1], [0, 0, 1, 1], [], []>} : vector<4x80xf32>, vector<80x16xf32>, vector<4x16xf32> -> vector<4x16xf32>
    %c1_122 = arith.constant 1 : index
    %c0_123 = arith.constant 0 : index
    %c0_124 = arith.constant 0 : index
    %115 = vector.load %arg5[%c1_122, %c0_123, %c0_124] : memref<6x80x16xf32, #tpu.memory_space<vmem>>, vector<1x80x16xf32>
    %116 = vector.shape_cast %115 : vector<1x80x16xf32> to vector<80x16xf32>
    %cst_125 = arith.constant dense<0.000000e+00> : vector<4x16xf32>
    %117 = tpu.matmul %108, %116, %cst_125 {dimension_numbers = #tpu.dot_dimension_numbers<[1], [0], [0], [1], [0, 0, 1, 1], [], []>} : vector<4x80xf32>, vector<80x16xf32>, vector<4x16xf32> -> vector<4x16xf32>
    %118 = arith.addf %114, %117 : vector<4x16xf32>
    %c2_126 = arith.constant 2 : index
    %c0_127 = arith.constant 0 : index
    %c0_128 = arith.constant 0 : index
    %119 = vector.load %arg5[%c2_126, %c0_127, %c0_128] : memref<6x80x16xf32, #tpu.memory_space<vmem>>, vector<1x80x16xf32>
    %120 = vector.shape_cast %119 : vector<1x80x16xf32> to vector<80x16xf32>
    %cst_129 = arith.constant dense<0.000000e+00> : vector<4x16xf32>
    %121 = tpu.matmul %111, %120, %cst_129 {dimension_numbers = #tpu.dot_dimension_numbers<[1], [0], [0], [1], [0, 0, 1, 1], [], []>} : vector<4x80xf32>, vector<80x16xf32>, vector<4x16xf32> -> vector<4x16xf32>
    %122 = arith.addf %118, %121 : vector<4x16xf32>
    %123 = arith.maximumf %102, %122 : vector<4x16xf32>
    %c3_130 = arith.constant 3 : index
    %c0_131 = arith.constant 0 : index
    %c0_132 = arith.constant 0 : index
    %124 = vector.load %arg5[%c3_130, %c0_131, %c0_132] : memref<6x80x16xf32, #tpu.memory_space<vmem>>, vector<1x80x16xf32>
    %125 = vector.shape_cast %124 : vector<1x80x16xf32> to vector<80x16xf32>
    %cst_133 = arith.constant dense<0.000000e+00> : vector<4x16xf32>
    %126 = tpu.matmul %105, %125, %cst_133 {dimension_numbers = #tpu.dot_dimension_numbers<[1], [0], [0], [1], [0, 0, 1, 1], [], []>} : vector<4x80xf32>, vector<80x16xf32>, vector<4x16xf32> -> vector<4x16xf32>
    %c4_134 = arith.constant 4 : index
    %c0_135 = arith.constant 0 : index
    %c0_136 = arith.constant 0 : index
    %127 = vector.load %arg5[%c4_134, %c0_135, %c0_136] : memref<6x80x16xf32, #tpu.memory_space<vmem>>, vector<1x80x16xf32>
    %128 = vector.shape_cast %127 : vector<1x80x16xf32> to vector<80x16xf32>
    %cst_137 = arith.constant dense<0.000000e+00> : vector<4x16xf32>
    %129 = tpu.matmul %108, %128, %cst_137 {dimension_numbers = #tpu.dot_dimension_numbers<[1], [0], [0], [1], [0, 0, 1, 1], [], []>} : vector<4x80xf32>, vector<80x16xf32>, vector<4x16xf32> -> vector<4x16xf32>
    %130 = arith.addf %126, %129 : vector<4x16xf32>
    %c5_138 = arith.constant 5 : index
    %c0_139 = arith.constant 0 : index
    %c0_140 = arith.constant 0 : index
    %131 = vector.load %arg5[%c5_138, %c0_139, %c0_140] : memref<6x80x16xf32, #tpu.memory_space<vmem>>, vector<1x80x16xf32>
    %132 = vector.shape_cast %131 : vector<1x80x16xf32> to vector<80x16xf32>
    %cst_141 = arith.constant dense<0.000000e+00> : vector<4x16xf32>
    %133 = tpu.matmul %111, %132, %cst_141 {dimension_numbers = #tpu.dot_dimension_numbers<[1], [0], [0], [1], [0, 0, 1, 1], [], []>} : vector<4x80xf32>, vector<80x16xf32>, vector<4x16xf32> -> vector<4x16xf32>
    %134 = arith.addf %130, %133 : vector<4x16xf32>
    %135 = arith.maximumf %123, %134 : vector<4x16xf32>
    %c0_142 = arith.constant 0 : index
    %c0_143 = arith.constant 0 : index
    %136 = vector.load %arg6[%c0_142, %c0_143] : memref<1x16xf32, #tpu.memory_space<vmem>>, vector<1x16xf32>
    %137 = vector.broadcast %136 : vector<1x16xf32> to vector<4x16xf32>
    %138 = arith.addf %135, %137 : vector<4x16xf32>
    %cst_144 = arith.constant 0.000000e+00 : f32
    %139 = vector.broadcast %cst_144 : f32 to vector<4x16xf32>
    %140 = arith.maximumf %138, %139 : vector<4x16xf32>
    %c0_145 = arith.constant 0 : index
    %c0_146 = arith.constant 0 : index
    %c0_147 = arith.constant 0 : index
    %141 = vector.load %arg7[%c0_145, %c0_146, %c0_147] : memref<3x10x4xf32, #tpu.memory_space<vmem>>, vector<1x10x4xf32>
    %142 = vector.shape_cast %141 : vector<1x10x4xf32> to vector<10x4xf32>
    %cst_148 = arith.constant dense<0.000000e+00> : vector<10x16xf32>
    %143 = tpu.matmul %142, %140, %cst_148 {dimension_numbers = #tpu.dot_dimension_numbers<[1], [0], [0], [1], [0, 0, 1, 1], [], []>} : vector<10x4xf32>, vector<4x16xf32>, vector<10x16xf32> -> vector<10x16xf32>
    %c1_149 = arith.constant 1 : index
    %c0_150 = arith.constant 0 : index
    %c0_151 = arith.constant 0 : index
    %144 = vector.load %arg7[%c1_149, %c0_150, %c0_151] : memref<3x10x4xf32, #tpu.memory_space<vmem>>, vector<1x10x4xf32>
    %145 = vector.shape_cast %144 : vector<1x10x4xf32> to vector<10x4xf32>
    %cst_152 = arith.constant dense<0.000000e+00> : vector<10x16xf32>
    %146 = tpu.matmul %145, %140, %cst_152 {dimension_numbers = #tpu.dot_dimension_numbers<[1], [0], [0], [1], [0, 0, 1, 1], [], []>} : vector<10x4xf32>, vector<4x16xf32>, vector<10x16xf32> -> vector<10x16xf32>
    %c2_153 = arith.constant 2 : index
    %c0_154 = arith.constant 0 : index
    %c0_155 = arith.constant 0 : index
    %147 = vector.load %arg7[%c2_153, %c0_154, %c0_155] : memref<3x10x4xf32, #tpu.memory_space<vmem>>, vector<1x10x4xf32>
    %148 = vector.shape_cast %147 : vector<1x10x4xf32> to vector<10x4xf32>
    %cst_156 = arith.constant dense<0.000000e+00> : vector<10x16xf32>
    %149 = tpu.matmul %148, %140, %cst_156 {dimension_numbers = #tpu.dot_dimension_numbers<[1], [0], [0], [1], [0, 0, 1, 1], [], []>} : vector<10x4xf32>, vector<4x16xf32>, vector<10x16xf32> -> vector<10x16xf32>
    %c0_157 = arith.constant 0 : index
    %c0_158 = arith.constant 0 : index
    %c0_159 = arith.constant 0 : index
    %150 = vector.load %arg8[%c0_157, %c0_158, %c0_159] : memref<3x16x80xf32, #tpu.memory_space<vmem>>, vector<1x16x80xf32>
    %151 = vector.shape_cast %150 : vector<1x16x80xf32> to vector<16x80xf32>
    %cst_160 = arith.constant dense<0.000000e+00> : vector<10x80xf32>
    %152 = tpu.matmul %143, %151, %cst_160 {dimension_numbers = #tpu.dot_dimension_numbers<[1], [0], [0], [1], [0, 0, 1, 1], [], []>} : vector<10x16xf32>, vector<16x80xf32>, vector<10x80xf32> -> vector<10x80xf32>
    %c1_161 = arith.constant 1 : index
    %c0_162 = arith.constant 0 : index
    %c0_163 = arith.constant 0 : index
    %153 = vector.load %arg8[%c1_161, %c0_162, %c0_163] : memref<3x16x80xf32, #tpu.memory_space<vmem>>, vector<1x16x80xf32>
    %154 = vector.shape_cast %153 : vector<1x16x80xf32> to vector<16x80xf32>
    %cst_164 = arith.constant dense<0.000000e+00> : vector<10x80xf32>
    %155 = tpu.matmul %146, %154, %cst_164 {dimension_numbers = #tpu.dot_dimension_numbers<[1], [0], [0], [1], [0, 0, 1, 1], [], []>} : vector<10x16xf32>, vector<16x80xf32>, vector<10x80xf32> -> vector<10x80xf32>
    %156 = arith.addf %152, %155 : vector<10x80xf32>
    %c2_165 = arith.constant 2 : index
    %c0_166 = arith.constant 0 : index
    %c0_167 = arith.constant 0 : index
    %157 = vector.load %arg8[%c2_165, %c0_166, %c0_167] : memref<3x16x80xf32, #tpu.memory_space<vmem>>, vector<1x16x80xf32>
    %158 = vector.shape_cast %157 : vector<1x16x80xf32> to vector<16x80xf32>
    %cst_168 = arith.constant dense<0.000000e+00> : vector<10x80xf32>
    %159 = tpu.matmul %149, %158, %cst_168 {dimension_numbers = #tpu.dot_dimension_numbers<[1], [0], [0], [1], [0, 0, 1, 1], [], []>} : vector<10x16xf32>, vector<16x80xf32>, vector<10x80xf32> -> vector<10x80xf32>
    %160 = arith.addf %156, %159 : vector<10x80xf32>
    %c0_169 = arith.constant 0 : index
    %c0_170 = arith.constant 0 : index
    %161 = vector.load %arg9[%c0_169, %c0_170] : memref<1x80xf32, #tpu.memory_space<vmem>>, vector<1x80xf32>
    %162 = vector.broadcast %161 : vector<1x80xf32> to vector<10x80xf32>
    %163 = arith.addf %160, %162 : vector<10x80xf32>
    %cst_171 = arith.constant 0.000000e+00 : f32
    %164 = vector.broadcast %cst_171 : f32 to vector<10x80xf32>
    %165 = arith.maximumf %163, %164 : vector<10x80xf32>
    %c0_172 = arith.constant 0 : index
    %c0_173 = arith.constant 0 : index
    %c0_174 = arith.constant 0 : index
    %166 = vector.load %arg10[%c0_172, %c0_173, %c0_174] : memref<5x30x10xf32, #tpu.memory_space<vmem>>, vector<1x30x10xf32>
    %167 = vector.shape_cast %166 : vector<1x30x10xf32> to vector<30x10xf32>
    %cst_175 = arith.constant dense<0.000000e+00> : vector<30x80xf32>
    %168 = tpu.matmul %167, %165, %cst_175 {dimension_numbers = #tpu.dot_dimension_numbers<[1], [0], [0], [1], [0, 0, 1, 1], [], []>} : vector<30x10xf32>, vector<10x80xf32>, vector<30x80xf32> -> vector<30x80xf32>
    %c1_176 = arith.constant 1 : index
    %c0_177 = arith.constant 0 : index
    %c0_178 = arith.constant 0 : index
    %169 = vector.load %arg10[%c1_176, %c0_177, %c0_178] : memref<5x30x10xf32, #tpu.memory_space<vmem>>, vector<1x30x10xf32>
    %170 = vector.shape_cast %169 : vector<1x30x10xf32> to vector<30x10xf32>
    %cst_179 = arith.constant dense<0.000000e+00> : vector<30x80xf32>
    %171 = tpu.matmul %170, %165, %cst_179 {dimension_numbers = #tpu.dot_dimension_numbers<[1], [0], [0], [1], [0, 0, 1, 1], [], []>} : vector<30x10xf32>, vector<10x80xf32>, vector<30x80xf32> -> vector<30x80xf32>
    %c2_180 = arith.constant 2 : index
    %c0_181 = arith.constant 0 : index
    %c0_182 = arith.constant 0 : index
    %172 = vector.load %arg10[%c2_180, %c0_181, %c0_182] : memref<5x30x10xf32, #tpu.memory_space<vmem>>, vector<1x30x10xf32>
    %173 = vector.shape_cast %172 : vector<1x30x10xf32> to vector<30x10xf32>
    %cst_183 = arith.constant dense<0.000000e+00> : vector<30x80xf32>
    %174 = tpu.matmul %173, %165, %cst_183 {dimension_numbers = #tpu.dot_dimension_numbers<[1], [0], [0], [1], [0, 0, 1, 1], [], []>} : vector<30x10xf32>, vector<10x80xf32>, vector<30x80xf32> -> vector<30x80xf32>
    %c3_184 = arith.constant 3 : index
    %c0_185 = arith.constant 0 : index
    %c0_186 = arith.constant 0 : index
    %175 = vector.load %arg10[%c3_184, %c0_185, %c0_186] : memref<5x30x10xf32, #tpu.memory_space<vmem>>, vector<1x30x10xf32>
    %176 = vector.shape_cast %175 : vector<1x30x10xf32> to vector<30x10xf32>
    %cst_187 = arith.constant dense<0.000000e+00> : vector<30x80xf32>
    %177 = tpu.matmul %176, %165, %cst_187 {dimension_numbers = #tpu.dot_dimension_numbers<[1], [0], [0], [1], [0, 0, 1, 1], [], []>} : vector<30x10xf32>, vector<10x80xf32>, vector<30x80xf32> -> vector<30x80xf32>
    %c4_188 = arith.constant 4 : index
    %c0_189 = arith.constant 0 : index
    %c0_190 = arith.constant 0 : index
    %178 = vector.load %arg10[%c4_188, %c0_189, %c0_190] : memref<5x30x10xf32, #tpu.memory_space<vmem>>, vector<1x30x10xf32>
    %179 = vector.shape_cast %178 : vector<1x30x10xf32> to vector<30x10xf32>
    %cst_191 = arith.constant dense<0.000000e+00> : vector<30x80xf32>
    %180 = tpu.matmul %179, %165, %cst_191 {dimension_numbers = #tpu.dot_dimension_numbers<[1], [0], [0], [1], [0, 0, 1, 1], [], []>} : vector<30x10xf32>, vector<10x80xf32>, vector<30x80xf32> -> vector<30x80xf32>
    %c0_192 = arith.constant 0 : index
    %c0_193 = arith.constant 0 : index
    %c0_194 = arith.constant 0 : index
    %181 = vector.load %arg11[%c0_192, %c0_193, %c0_194] : memref<5x80x120xf32, #tpu.memory_space<vmem>>, vector<1x80x120xf32>
    %182 = vector.shape_cast %181 : vector<1x80x120xf32> to vector<80x120xf32>
    %cst_195 = arith.constant dense<0.000000e+00> : vector<30x120xf32>
    %183 = tpu.matmul %168, %182, %cst_195 {dimension_numbers = #tpu.dot_dimension_numbers<[1], [0], [0], [1], [0, 0, 1, 1], [], []>} : vector<30x80xf32>, vector<80x120xf32>, vector<30x120xf32> -> vector<30x120xf32>
    %c1_196 = arith.constant 1 : index
    %c0_197 = arith.constant 0 : index
    %c0_198 = arith.constant 0 : index
    %184 = vector.load %arg11[%c1_196, %c0_197, %c0_198] : memref<5x80x120xf32, #tpu.memory_space<vmem>>, vector<1x80x120xf32>
    %185 = vector.shape_cast %184 : vector<1x80x120xf32> to vector<80x120xf32>
    %cst_199 = arith.constant dense<0.000000e+00> : vector<30x120xf32>
    %186 = tpu.matmul %171, %185, %cst_199 {dimension_numbers = #tpu.dot_dimension_numbers<[1], [0], [0], [1], [0, 0, 1, 1], [], []>} : vector<30x80xf32>, vector<80x120xf32>, vector<30x120xf32> -> vector<30x120xf32>
    %187 = arith.addf %183, %186 : vector<30x120xf32>
    %c2_200 = arith.constant 2 : index
    %c0_201 = arith.constant 0 : index
    %c0_202 = arith.constant 0 : index
    %188 = vector.load %arg11[%c2_200, %c0_201, %c0_202] : memref<5x80x120xf32, #tpu.memory_space<vmem>>, vector<1x80x120xf32>
    %189 = vector.shape_cast %188 : vector<1x80x120xf32> to vector<80x120xf32>
    %cst_203 = arith.constant dense<0.000000e+00> : vector<30x120xf32>
    %190 = tpu.matmul %174, %189, %cst_203 {dimension_numbers = #tpu.dot_dimension_numbers<[1], [0], [0], [1], [0, 0, 1, 1], [], []>} : vector<30x80xf32>, vector<80x120xf32>, vector<30x120xf32> -> vector<30x120xf32>
    %191 = arith.addf %187, %190 : vector<30x120xf32>
    %c3_204 = arith.constant 3 : index
    %c0_205 = arith.constant 0 : index
    %c0_206 = arith.constant 0 : index
    %192 = vector.load %arg11[%c3_204, %c0_205, %c0_206] : memref<5x80x120xf32, #tpu.memory_space<vmem>>, vector<1x80x120xf32>
    %193 = vector.shape_cast %192 : vector<1x80x120xf32> to vector<80x120xf32>
    %cst_207 = arith.constant dense<0.000000e+00> : vector<30x120xf32>
    %194 = tpu.matmul %177, %193, %cst_207 {dimension_numbers = #tpu.dot_dimension_numbers<[1], [0], [0], [1], [0, 0, 1, 1], [], []>} : vector<30x80xf32>, vector<80x120xf32>, vector<30x120xf32> -> vector<30x120xf32>
    %195 = arith.addf %191, %194 : vector<30x120xf32>
    %c4_208 = arith.constant 4 : index
    %c0_209 = arith.constant 0 : index
    %c0_210 = arith.constant 0 : index
    %196 = vector.load %arg11[%c4_208, %c0_209, %c0_210] : memref<5x80x120xf32, #tpu.memory_space<vmem>>, vector<1x80x120xf32>
    %197 = vector.shape_cast %196 : vector<1x80x120xf32> to vector<80x120xf32>
    %cst_211 = arith.constant dense<0.000000e+00> : vector<30x120xf32>
    %198 = tpu.matmul %180, %197, %cst_211 {dimension_numbers = #tpu.dot_dimension_numbers<[1], [0], [0], [1], [0, 0, 1, 1], [], []>} : vector<30x80xf32>, vector<80x120xf32>, vector<30x120xf32> -> vector<30x120xf32>
    %199 = arith.addf %195, %198 : vector<30x120xf32>
    %c0_212 = arith.constant 0 : index
    %c0_213 = arith.constant 0 : index
    %200 = vector.load %arg12[%c0_212, %c0_213] : memref<1x120xf32, #tpu.memory_space<vmem>>, vector<1x120xf32>
    %201 = vector.broadcast %200 : vector<1x120xf32> to vector<30x120xf32>
    %202 = arith.addf %199, %201 : vector<30x120xf32>
    %cst_214 = arith.constant 0.000000e+00 : f32
    %203 = vector.broadcast %cst_214 : f32 to vector<30x120xf32>
    %204 = arith.maximumf %202, %203 : vector<30x120xf32>
    %c0_215 = arith.constant 0 : index
    %c0_216 = arith.constant 0 : index
    %c0_217 = arith.constant 0 : index
    %205 = vector.load %arg13[%c0_215, %c0_216, %c0_217] : memref<2x56x30xf32, #tpu.memory_space<vmem>>, vector<1x56x30xf32>
    %206 = vector.shape_cast %205 : vector<1x56x30xf32> to vector<56x30xf32>
    %cst_218 = arith.constant dense<0.000000e+00> : vector<56x120xf32>
    %207 = tpu.matmul %206, %204, %cst_218 {dimension_numbers = #tpu.dot_dimension_numbers<[1], [0], [0], [1], [0, 0, 1, 1], [], []>} : vector<56x30xf32>, vector<30x120xf32>, vector<56x120xf32> -> vector<56x120xf32>
    %c1_219 = arith.constant 1 : index
    %c0_220 = arith.constant 0 : index
    %c0_221 = arith.constant 0 : index
    %208 = vector.load %arg13[%c1_219, %c0_220, %c0_221] : memref<2x56x30xf32, #tpu.memory_space<vmem>>, vector<1x56x30xf32>
    %209 = vector.shape_cast %208 : vector<1x56x30xf32> to vector<56x30xf32>
    %cst_222 = arith.constant dense<0.000000e+00> : vector<56x120xf32>
    %210 = tpu.matmul %209, %204, %cst_222 {dimension_numbers = #tpu.dot_dimension_numbers<[1], [0], [0], [1], [0, 0, 1, 1], [], []>} : vector<56x30xf32>, vector<30x120xf32>, vector<56x120xf32> -> vector<56x120xf32>
    %c0_223 = arith.constant 0 : index
    %c0_224 = arith.constant 0 : index
    %c0_225 = arith.constant 0 : index
    %211 = vector.load %arg14[%c0_223, %c0_224, %c0_225] : memref<2x120x28xf32, #tpu.memory_space<vmem>>, vector<1x120x28xf32>
    %212 = vector.shape_cast %211 : vector<1x120x28xf32> to vector<120x28xf32>
    %cst_226 = arith.constant dense<0.000000e+00> : vector<56x28xf32>
    %213 = tpu.matmul %207, %212, %cst_226 {dimension_numbers = #tpu.dot_dimension_numbers<[1], [0], [0], [1], [0, 0, 1, 1], [], []>} : vector<56x120xf32>, vector<120x28xf32>, vector<56x28xf32> -> vector<56x28xf32>
    %c1_227 = arith.constant 1 : index
    %c0_228 = arith.constant 0 : index
    %c0_229 = arith.constant 0 : index
    %214 = vector.load %arg14[%c1_227, %c0_228, %c0_229] : memref<2x120x28xf32, #tpu.memory_space<vmem>>, vector<1x120x28xf32>
    %215 = vector.shape_cast %214 : vector<1x120x28xf32> to vector<120x28xf32>
    %cst_230 = arith.constant dense<0.000000e+00> : vector<56x28xf32>
    %216 = tpu.matmul %210, %215, %cst_230 {dimension_numbers = #tpu.dot_dimension_numbers<[1], [0], [0], [1], [0, 0, 1, 1], [], []>} : vector<56x120xf32>, vector<120x28xf32>, vector<56x28xf32> -> vector<56x28xf32>
    %217 = arith.addf %213, %216 : vector<56x28xf32>
    %c0_231 = arith.constant 0 : index
    %c0_232 = arith.constant 0 : index
    %218 = vector.load %arg15[%c0_231, %c0_232] : memref<1x28xf32, #tpu.memory_space<vmem>>, vector<1x28xf32>
    %219 = vector.broadcast %218 : vector<1x28xf32> to vector<56x28xf32>
    %220 = arith.addf %217, %219 : vector<56x28xf32>
    %221 = arith.negf %220 : vector<56x28xf32>
    %222 = math.exp %221 : vector<56x28xf32>
    %cst_233 = arith.constant 1.000000e+00 : f32
    %223 = vector.broadcast %cst_233 : f32 to vector<56x28xf32>
    %224 = arith.addf %223, %222 : vector<56x28xf32>
    %225 = arith.divf %223, %224 : vector<56x28xf32>
    %c0_234 = arith.constant 0 : index
    %c0_235 = arith.constant 0 : index
    %226 = vector.load %arg16[%c0_234, %c0_235] : memref<56x28xf32, #tpu.memory_space<vmem>>, vector<56x28xf32>
    tpu.vector_store %arg16[%c0_234, %c0_235], %225 {strides = array<i32>} : memref<56x28xf32, #tpu.memory_space<vmem>>, vector<56x28xf32>,
    return
  }
}

</mosaic_0001>

<bundles_post_ra>
// kernel: cnn_ae_forward.1
= control target key start
LH: loop header
LB: loop body
LE: loop exit
PB: predicated region body
PF: predicated region fallthrough
CT: control target
= control target key end

     0   :  { %s8774_s0 = inlined_call_operand.vmem [shape: f32[56,28], index: 0, kind: input, shape index: {}]   ;;  %s8775_s1 = inlined_call_operand.vmem [shape: f32[6,10,56], index: 1, kind: input, shape index: {}]   ;;  %s8776_s2 = inlined_call_operand.vmem [shape: f32[6,28,80], index: 2, kind: input, shape index: {}]   ;;  %s8777_s3 = inlined_call_operand.vmem [shape: f32[1,80], index: 3, kind: input, shape index: {}]   ;;  %s8778_s4 = inlined_call_operand.vmem [shape: f32[6,4,10], index: 4, kind: input, shape index: {}]   ;;  %s8779_s5 = inlined_call_operand.vmem [shape: f32[6,80,16], index: 5, kind: input, shape index: {}]   ;;  %s8780_s6 = inlined_call_operand.vmem [shape: f32[1,16], index: 6, kind: input, shape index: {}]   ;;  %s8781_s7 = inlined_call_operand.vmem [shape: f32[3,10,4], index: 7, kind: input, shape index: {}]   ;;  %s8782_s8 = inlined_call_operand.vmem [shape: f32[3,16,80], index: 8, kind: input, shape index: {}]   ;;  %s8783_s9 = inlined_call_operand.vmem [shape: f32[1,80], index: 9, kind: input, shape index: {}]   ;;  %s8784_s10 = inlined_call_operand.vmem [shape: f32[5,30,10], index: 10, kind: input, shape index: {}]   ;;  %s8785_s11 = inlined_call_operand.vmem [shape: f32[5,80,120], index: 11, kind: input, shape index: {}]   ;;  %s8786_s12 = inlined_call_operand.vmem [shape: f32[1,120], index: 12, kind: input, shape index: {}]   ;;  %s8787_s13 = inlined_call_operand.vmem [shape: f32[2,56,30], index: 13, kind: input, shape index: {}]   ;;  %s8788_s14 = inlined_call_operand.vmem [shape: f32[2,120,28], index: 14, kind: input, shape index: {}]   ;;  %s8789_s15 = inlined_call_operand.vmem [shape: f32[1,28], index: 15, kind: input, shape index: {}]   ;;  %s8790_s16 = inlined_call_operand.hbm [shape: f32[56,28], index: 16, kind: output, shape index: {}]  }
   0x1   :  { %8794 = sst [smem:[#allocation7_spill]] %s8774_s0 }
   0x2   :  { %s8795_s23 = sld [smem:[#allocation7_spill]] }
   0x8   :  { %v7066_v0 = vld [vmem:[%s8795_s23 + $0x30] sm:$0xff]  ;;  %v7071_v1 = vld [vmem:[%s8795_s23 + $0x28] sm:$0xff]  ;;  %v7080_v2 = vld [vmem:[%s8795_s23 + $0x20] sm:$0xff] }
   0x9   :  { %5990 = vmatprep.subr.mxu0 %v7066_v0  ;;  %6007 = vmatprep.subr.mxu1 %v7066_v0  ;;  %v7089_v3 = vld [vmem:[%s8795_s23 + $0x18] sm:$0xff]  ;;  %v7098_v4 = vld [vmem:[%s8795_s23 + $0x10] sm:$0xff] }
   0xa   :  { %5991 = vmatpush3.msra.mxu0 %v7066_v0  ;;  %6008 = vmatpush3.msra.mxu1 %v7066_v0 }
   0xb   :  { %5992 = vmatprep.subr.mxu0 %v7071_v1  ;;  %6009 = vmatprep.subr.mxu1 %v7071_v1 }
   0xc   :  { %5993 = vmatpush3.msra.mxu0 %v7071_v1  ;;  %6010 = vmatpush3.msra.mxu1 %v7071_v1 }
   0xd   :  { %5994 = vmatprep.subr.mxu0 %v7080_v2  ;;  %6011 = vmatprep.subr.mxu1 %v7080_v2 }
   0xe   :  { %5995 = vmatpush3.msra.mxu0 %v7080_v2  ;;  %6012 = vmatpush3.msra.mxu1 %v7080_v2 }
   0xf   :  { %21 = vsyncpa [#allocation3], 0  ;;  %5996 = vmatprep.subr.mxu0 %v7089_v3  ;;  %6013 = vmatprep.subr.mxu1 %v7089_v3  ;;  %v7107_v5 = vld [vmem:[%s8795_s23 + $0x8] sm:$0xff]  ;;  %v7116_v6 = vld [vmem:[%s8795_s23] sm:$0xff]  ;;  %vm63_vm0 = vcmask 457728   ;;  %vm329_vm1 = vcmask 1043456  }
  0x10   :  { %5997 = vmatpush3.msra.mxu0 %v7089_v3  ;;  %6014 = vmatpush3.msra.mxu1 %v7089_v3  ;;  %v61_v7 = vld [vmem:[%s8775_s1] sm:$0xff]  ;;  %v5184_v8 = vld [vmem:[%s8775_s1 + $0x10] sm:$0xff]  ;;  %v62_v9 = vld [vmem:[%s8775_s1 + $0x8] sm:$0x3]  ;;  %vm322_vm2 = vcmask 228352   ;;  %vm6974_vm3 = vmmov 0  }
  0x11   :  { %5998 = vmatprep.subr.mxu0 %v7098_v4  ;;  %6015 = vmatprep.subr.mxu1 %v7098_v4  ;;  %v5185_v10 = vld [vmem:[%s8775_s1 + $0x18] sm:$0x3]  ;;  %v5188_v11 = vld [vmem:[%s8775_s1 + $0x20] sm:$0xff]  ;;  %v7155_v13 = vld [vmem:[%s8776_s2 + $0x30] sm:$0xff]  ;;  %vm1580_vm4 = vcmask 1041408   ;;  %vm1576_vm5 = vcmask 80896  }
  0x12   :  { %5999 = vmatpush3.msra.mxu0 %v7098_v4  ;;  %6016 = vmatpush3.msra.mxu1 %v7098_v4  ;;  %v7146_v12 = vld [vmem:[%s8776_s2 + $0x38] sm:$0xf]  ;;  %v7166_v14 = vld [vmem:[%s8776_s2 + $0x28] sm:$0xff]  ;;  %v7194_v17 = vld [vmem:[%s8776_s2 + $0x70] sm:$0xff]  ;;  %vm1825_vm6 = vcmask 654336   ;;  %vm2971_vm7 = vcmask 31744  }
  0x13   :  { %6000 = vmatprep.subr.mxu0 %v7107_v5  ;;  %6017 = vmatprep.subr.mxu1 %v7107_v5  ;;  %v5189_v15 = vld [vmem:[%s8775_s1 + $0x28] sm:$0x3]  ;;  %v7187_v16 = vld [vmem:[%s8776_s2 + $0x78] sm:$0xf]  ;;  %v7211_v19 = vld [vmem:[%s8776_s2 + $0x20] sm:$0xff]  ;;  %vm3229_vm8 = vcmask 130048  }
  0x14   :  { %6001 = vmatpush3.msra.mxu0 %v7107_v5  ;;  %6018 = vmatpush3.msra.mxu1 %v7107_v5  ;;  %v7206_v18 = vld [vmem:[%s8776_s2 + $0x68] sm:$0xff]  ;;  %v7220_v20 = vld [vmem:[%s8776_s2 + $0x60] sm:$0xff]  ;;  %v7226_v21 = vld [vmem:[%s8776_s2 + $0x18] sm:$0xf]  ;;  %vm4596_vm9 = vcmask 1045504   ;;  %vm4574_vm10 = vcmask 244736  }
  0x15   :  { %6002 = vmatprep.subr.mxu0 %v7116_v6  ;;  %6019 = vmatprep.subr.mxu1 %v7116_v6  ;;  %v7239_v26 = vld [vmem:[%s8776_s2 + $0x10] sm:$0xff]  ;;  %v7250_v27 = vld [vmem:[%s8776_s2 + $0x8] sm:$0xff]  ;;  %v7258_v28 = vld [vmem:[%s8776_s2] sm:$0xff]  ;;  %vm4860_vm11 = vcmask 982016  }
  0x16   :  { %6003 = vmatpush3.msra.mxu0 %v7116_v6  ;;  %6004 = vmatprep.mubr.msk.f32.mxu0 %vm63_vm0, %v61_v7  ;;  %v7267_v29 = vld [vmem:[%s8776_s2 + $0x58] sm:$0xf]  ;;  %v7276_v30 = vld [vmem:[%s8776_s2 + $0x50] sm:$0xff]  ;;  %v7287_v31 = vld [vmem:[%s8776_s2 + $0x48] sm:$0xff] }
  0x17   :  { %6020 = vmatpush3.msra.mxu1 %v7116_v6  ;;  %6021 = vmatprep.mubr.msk.f32.mxu1 %vm63_vm0, %v5184_v8  ;;  %v7296_v33 = vld [vmem:[%s8776_s2 + $0x40] sm:$0xff]  ;;  %v7305_v35 = vld [vmem:[%s8776_s2 + $0x98] sm:$0xf]  ;;  %v7314_v36 = vld [vmem:[%s8776_s2 + $0x90] sm:$0xff] }
  0x18   :  { %6005 = vmatmul.mubr.msk.f32.vlgmr.msra.gmra.mxu0 %vm63_vm0, %v62_v9  ;;  %6022 = vmatmul.mubr.msk.f32.vlgmr.msra.gmra.mxu1 %vm63_vm0, %v5185_v10  ;;  %v5230_v37 = vld [vmem:[%s8775_s1 + $0x30] sm:$0xff]  ;;  %v7329_v38 = vld [vmem:[%s8776_s2 + $0x88] sm:$0xff]  ;;  %v5231_v39 = vld [vmem:[%s8775_s1 + $0x38] sm:$0x3] }
  0x19   :  { %6024 = vmatprep.subr.mxu0 %v7066_v0  ;;  %6038 = vmatprep.mubr.msk.f32.mxu0 %vm63_vm0, %v5188_v11  ;;  %v7341_v40 = vld [vmem:[%s8776_s2 + $0x80] sm:$0xff]  ;;  %v7350_v41 = vld [vmem:[%s8776_s2 + $0xb8] sm:$0xf]  ;;  %v7363_v42 = vld [vmem:[%s8776_s2 + $0xb0] sm:$0xff] }
  0x1a   :  { %6025 = vmatpush3.msra.mxu0 %v7066_v0  ;;  %6041 = vmatprep.subr.msk.mxu1 %vm329_vm1, %v7146_v12  ;;  %v7373_v43 = vld [vmem:[%s8776_s2 + $0xa8] sm:$0xff]  ;;  %v7382_v44 = vld [vmem:[%s8776_s2 + $0xa0] sm:$0xff]  ;;  %v5238_v45 = vld [vmem:[%s8775_s1 + $0x50] sm:$0xff] }
  0x1b   :  { %6026 = vmatprep.subr.mxu0 %v7071_v1  ;;  %6042 = vmatpush3.msk.msra.mxu1 %vm329_vm1, %v7146_v12  ;;  %v5239_v46 = vld [vmem:[%s8775_s1 + $0x58] sm:$0x3]  ;;  %v5234_v47 = vld [vmem:[%s8775_s1 + $0x40] sm:$0xff]  ;;  %v5235_v48 = vld [vmem:[%s8775_s1 + $0x48] sm:$0x3] }
  0x1c   :  { %6027 = vmatpush3.msra.mxu0 %v7071_v1  ;;  %6043 = vmatprep.subr.mxu1 %v7155_v13 }
  0x1d   :  { %6028 = vmatprep.subr.mxu0 %v7080_v2  ;;  %6044 = vmatpush3.msra.mxu1 %v7155_v13 }
  0x1e   :  { %6029 = vmatpush3.msra.mxu0 %v7080_v2  ;;  %6045 = vmatprep.subr.mxu1 %v7166_v14 }
  0x1f   :  { %6030 = vmatprep.subr.mxu0 %v7089_v3  ;;  %6046 = vmatpush3.msra.mxu1 %v7166_v14 }
  0x20   :  { %6031 = vmatpush3.msra.mxu0 %v7089_v3  ;;  %6047 = vmatprep.subr.mxu1 %v7211_v19 }
  0x21   :  { %6032 = vmatprep.subr.mxu0 %v7098_v4  ;;  %6048 = vmatpush3.msra.mxu1 %v7211_v19 }
  0x22   :  { %6033 = vmatpush3.msra.mxu0 %v7098_v4  ;;  %6052 = vmatprep.subr.msk.mxu1 %vm329_vm1, %v7226_v21 }
  0x23   :  { %6034 = vmatprep.subr.mxu0 %v7107_v5 }
  0x24   :  { %6035 = vmatpush3.msra.mxu0 %v7107_v5 }
  0x25   :  { %6036 = vmatprep.subr.mxu0 %v7116_v6 }
  0x26   :  { %6037 = vmatpush3.msra.mxu0 %v7116_v6 }
  0x27   :  { %6039 = vmatmul.mubr.msk.f32.vlgmr.msra.gmra.mxu0 %vm63_vm0, %v5189_v15  ;;  %6085 = vmatprep.subr.msk.mxu0 %vm329_vm1, %v7187_v16 }
  0x28   :  { %6086 = vmatpush3.msk.msra.mxu0 %vm329_vm1, %v7187_v16 }
  0x29   :  { %6087 = vmatprep.subr.mxu0 %v7194_v17 }
  0x2a   :  { %6088 = vmatpush3.msra.mxu0 %v7194_v17 }
  0x2b   :  { %6089 = vmatprep.subr.mxu0 %v7206_v18 }
  0x2c   :  { %6090 = vmatpush3.msra.mxu0 %v7206_v18 }
  0x2d   :  { %6091 = vmatprep.subr.mxu0 %v7220_v20 }
  0x2e   :  { %6092 = vmatpush3.msra.mxu0 %v7220_v20 }
  0x2f   :  { %6107 = vmatprep.subr.mxu0 %v7066_v0 }
  0xd8   :  { %v6006_v22 = vpop.f32.mrf.mxu0  ;;  %v7232_v23 = vpop.f32.mrf.mxu1 }
  0xda   :  { %v136_v24 = vpop.f32.mrf.mxu0  ;;  %v220_v25 = vpop.f32.mrf.mxu1 }
  0xdb   :  { %6049 = vmatprep.mubr.msk.f32.mxu1 %vm322_vm2, %v220_v25  ;;  %6093 = vmatprep.mubr.msk.f32.mxu0 %vm322_vm2, %v136_v24 }
  0xdc   :  { %6050 = vmatmul.mubr.msk.f32.vlgmr.msra.gmra.mxu1 %vm322_vm2, %v7232_v23  ;;  %6094 = vmatmul.mubr.msk.f32.vlgmr.msra.gmra.mxu0 %vm322_vm2, %v6006_v22 }
  0xdd   :  { %6053 = vmatpush3.msk.msra.mxu1 %vm329_vm1, %v7226_v21  ;;  %6060 = vmatprep.mubr.msk.f32.mxu1 %vm322_vm2, %v136_v24 }
  0xde   :  { %6054 = vmatprep.subr.mxu1 %v7239_v26  ;;  %6108 = vmatpush3.msra.mxu0 %v7066_v0 }
  0xdf   :  { %6055 = vmatpush3.msra.mxu1 %v7239_v26  ;;  %6109 = vmatprep.subr.mxu0 %v7071_v1 }
  0xe0   :  { %6056 = vmatprep.subr.mxu1 %v7250_v27  ;;  %6110 = vmatpush3.msra.mxu0 %v7071_v1 }
  0xe1   :  { %6057 = vmatpush3.msra.mxu1 %v7250_v27  ;;  %6111 = vmatprep.subr.mxu0 %v7080_v2 }
  0xe2   :  { %6058 = vmatprep.subr.mxu1 %v7258_v28  ;;  %6112 = vmatpush3.msra.mxu0 %v7080_v2 }
  0xe3   :  { %6059 = vmatpush3.msra.mxu1 %v7258_v28  ;;  %6113 = vmatprep.subr.mxu0 %v7089_v3 }
  0xe4   :  { %6061 = vmatmul.mubr.msk.f32.vlgmr.msra.gmra.mxu1 %vm322_vm2, %v6006_v22  ;;  %6063 = vmatprep.subr.msk.mxu1 %vm329_vm1, %v7267_v29 }
  0xe5   :  { %6064 = vmatpush3.msk.msra.mxu1 %vm329_vm1, %v7267_v29  ;;  %6114 = vmatpush3.msra.mxu0 %v7089_v3 }
  0xe6   :  { %6065 = vmatprep.subr.mxu1 %v7276_v30  ;;  %6115 = vmatprep.subr.mxu0 %v7098_v4 }
  0xe7   :  { %v6040_v32 = vpop.f32.mrf.mxu0  ;;  %6066 = vmatpush3.msra.mxu1 %v7276_v30  ;;  %6116 = vmatpush3.msra.mxu0 %v7098_v4 }
  0xe8   :  { %6067 = vmatprep.subr.mxu1 %v7287_v31  ;;  %6117 = vmatprep.subr.mxu0 %v7107_v5 }
  0xe9   :  { %v304_v34 = vpop.f32.mrf.mxu0  ;;  %6068 = vmatpush3.msra.mxu1 %v7287_v31  ;;  %6118 = vmatpush3.msra.mxu0 %v7107_v5 }
  0xea   :  { %6069 = vmatprep.subr.mxu1 %v7296_v33  ;;  %6071 = vmatprep.mubr.msk.f32.mxu1 %vm322_vm2, %v304_v34 }
  0xeb   :  { %6070 = vmatpush3.msra.mxu1 %v7296_v33  ;;  %6119 = vmatprep.subr.mxu0 %v7116_v6 }
  0xec   :  { %6072 = vmatmul.mubr.msk.f32.vlgmr.msra.gmra.mxu1 %vm322_vm2, %v6040_v32  ;;  %6074 = vmatprep.subr.msk.mxu1 %vm329_vm1, %v7305_v35 }
  0xed   :  { %6075 = vmatpush3.msk.msra.mxu1 %vm329_vm1, %v7305_v35  ;;  %6082 = vmatprep.mubr.msk.f32.mxu1 %vm322_vm2, %v220_v25 }
  0xee   :  { %6076 = vmatprep.subr.mxu1 %v7314_v36  ;;  %6120 = vmatpush3.msra.mxu0 %v7116_v6 }
  0xef   :  { %6077 = vmatpush3.msra.mxu1 %v7314_v36  ;;  %6121 = vmatprep.mubr.msk.f32.mxu0 %vm63_vm0, %v5230_v37 }
  0xf0   :  { %6078 = vmatprep.subr.mxu1 %v7329_v38  ;;  %6141 = vmatprep.subr.mxu0 %v7066_v0 }
  0xf1   :  { %6079 = vmatpush3.msra.mxu1 %v7329_v38  ;;  %6122 = vmatmul.mubr.msk.f32.vlgmr.msra.gmra.mxu0 %vm63_vm0, %v5231_v39 }
  0xf2   :  { %6080 = vmatprep.subr.mxu1 %v7341_v40  ;;  %6142 = vmatpush3.msra.mxu0 %v7066_v0 }
  0xf3   :  { %6081 = vmatpush3.msra.mxu1 %v7341_v40  ;;  %6143 = vmatprep.subr.mxu0 %v7071_v1 }
  0xf4   :  { %6083 = vmatmul.mubr.msk.f32.vlgmr.msra.gmra.mxu1 %vm322_vm2, %v7232_v23  ;;  %6096 = vmatprep.subr.msk.mxu1 %vm329_vm1, %v7350_v41 }
  0xf5   :  { %6144 = vmatpush3.msra.mxu0 %v7071_v1  ;;  %6097 = vmatpush3.msk.msra.mxu1 %vm329_vm1, %v7350_v41 }
  0xf6   :  { %6104 = vmatprep.mubr.msk.f32.mxu1 %vm322_vm2, %v304_v34  ;;  %6145 = vmatprep.subr.mxu0 %v7080_v2 }
  0xf7   :  { %6098 = vmatprep.subr.mxu1 %v7363_v42  ;;  %6146 = vmatpush3.msra.mxu0 %v7080_v2 }
  0xf8   :  { %6099 = vmatpush3.msra.mxu1 %v7363_v42  ;;  %6147 = vmatprep.subr.mxu0 %v7089_v3 }
  0xf9   :  { %6100 = vmatprep.subr.mxu1 %v7373_v43  ;;  %6148 = vmatpush3.msra.mxu0 %v7089_v3 }
  0xfa   :  { %6101 = vmatpush3.msra.mxu1 %v7373_v43  ;;  %6149 = vmatprep.subr.mxu0 %v7098_v4 }
  0xfb   :  { %6102 = vmatprep.subr.mxu1 %v7382_v44  ;;  %6150 = vmatpush3.msra.mxu0 %v7098_v4 }
  0xfc   :  { %6103 = vmatpush3.msra.mxu1 %v7382_v44  ;;  %6151 = vmatprep.subr.mxu0 %v7107_v5 }
  0xfd   :  { %6105 = vmatmul.mubr.msk.f32.vlgmr.msra.gmra.mxu1 %vm322_vm2, %v6040_v32  ;;  %6124 = vmatprep.subr.mxu1 %v7066_v0 }
  0xfe   :  { %6152 = vmatpush3.msra.mxu0 %v7107_v5  ;;  %6125 = vmatpush3.msra.mxu1 %v7066_v0 }
  0xff   :  { %6153 = vmatprep.subr.mxu0 %v7116_v6  ;;  %6126 = vmatprep.subr.mxu1 %v7071_v1 }
 0x100   :  { %6154 = vmatpush3.msra.mxu0 %v7116_v6  ;;  %6155 = vmatprep.mubr.msk.f32.mxu0 %vm63_vm0, %v5238_v45  ;;  %v5263_v45 = vld [vmem:[%s8778_s4 + $0x4] sm:$0xf] }
 0x101   :  { %6127 = vmatpush3.msra.mxu1 %v7071_v1  ;;  %6156 = vmatmul.mubr.msk.f32.vlgmr.msra.gmra.mxu0 %vm63_vm0, %v5239_v46  ;;  %v7555_v46 = vld [vmem:[%s8779_s5 + $0x48] sm:$0xff] }
 0x102   :  { %6128 = vmatprep.subr.mxu1 %v7080_v2  ;;  %6138 = vmatprep.mubr.msk.f32.mxu1 %vm63_vm0, %v5234_v47  ;;  %v7564_v47 = vld [vmem:[%s8779_s5 + $0x40] sm:$0xff] }
 0x103   :  { %6129 = vmatpush3.msra.mxu1 %v7080_v2  ;;  %6180 = vmatprep.subr.msk.mxu0 %vm329_vm1, %v7267_v29 }
 0x104   :  { %6130 = vmatprep.subr.mxu1 %v7089_v3  ;;  %6181 = vmatpush3.msk.msra.mxu0 %vm329_vm1, %v7267_v29 }
 0x105   :  { %6131 = vmatpush3.msra.mxu1 %v7089_v3  ;;  %6182 = vmatprep.subr.mxu0 %v7276_v30 }
 0x106   :  { %6132 = vmatprep.subr.mxu1 %v7098_v4  ;;  %6183 = vmatpush3.msra.mxu0 %v7276_v30 }
 0x107   :  { %6133 = vmatpush3.msra.mxu1 %v7098_v4  ;;  %6184 = vmatprep.subr.mxu0 %v7287_v31 }
 0x108   :  { %6134 = vmatprep.subr.mxu1 %v7107_v5  ;;  %6185 = vmatpush3.msra.mxu0 %v7287_v31 }
 0x109   :  { %6135 = vmatpush3.msra.mxu1 %v7107_v5  ;;  %6186 = vmatprep.subr.mxu0 %v7296_v33 }
 0x10a   :  { %6136 = vmatprep.subr.mxu1 %v7116_v6  ;;  %6187 = vmatpush3.msra.mxu0 %v7296_v33  ;;  %v5260_v33 = vld [vmem:[%s8777_s3] ss:$0 sm:$0xff] }
 0x10b   :  { %6137 = vmatpush3.msra.mxu1 %v7116_v6  ;;  %6202 = vmatprep.subr.msk.mxu0 %vm329_vm1, %v7187_v16 }
 0x10c   :  { %6139 = vmatmul.mubr.msk.f32.vlgmr.msra.gmra.mxu1 %vm63_vm0, %v5235_v48  ;;  %6158 = vmatprep.subr.msk.mxu1 %vm329_vm1, %v7146_v12  ;;  %v7569_v48 = vld [vmem:[%s8779_s5 + $0x98] sm:$0xff] }
 0x10d   :  { %6159 = vmatpush3.msk.msra.mxu1 %vm329_vm1, %v7146_v12 }
 0x10e   :  { %6160 = vmatprep.subr.mxu1 %v7155_v13 }
 0x10f   :  { %6161 = vmatpush3.msra.mxu1 %v7155_v13  ;;  %v6973_v13 = vmov 0.0  }
 0x110   :  { %6162 = vmatprep.subr.mxu1 %v7166_v14 }
 0x111   :  { %6163 = vmatpush3.msra.mxu1 %v7166_v14 }
 0x112   :  { %6164 = vmatprep.subr.mxu1 %v7211_v19 }
 0x113   :  { %6165 = vmatpush3.msra.mxu1 %v7211_v19 }
 0x114   :  { %6169 = vmatprep.subr.msk.mxu1 %vm329_vm1, %v7226_v21 }
 0x19c   :  { %v6051_v49 = vpop.f32.mrf.mxu1  ;;  %v6095_v59 = vpop.f32.mrf.mxu0 }
 0x19e   :  { %v399_v50 = vpop.f32.mrf.mxu1  ;;  %v740_v62 = vpop.f32.mrf.mxu0 }
 0x1a4   :  { %v6062_v51 = vpop.f32.mrf.mxu1 }
 0x1a5   :  { %v489_v52 = vadd.f32 %v6062_v51, %v6051_v49  ;;  %v7578_v49 = vld [vmem:[%s8779_s5 + $0x38] sm:$0xff]  ;;  %v7592_v51 = vld [vmem:[%s8779_s5 + $0x30] sm:$0xff] }
 0x1a6   :  { %v483_v53 = vpop.f32.mrf.mxu1 }
 0x1a7   :  { %v484_v54 = vadd.f32 %v483_v53, %v399_v50  ;;  %v7583_v50 = vld [vmem:[%s8779_s5 + $0x90] sm:$0xff]  ;;  %v7606_v53 = vld [vmem:[%s8779_s5 + $0x28] sm:$0xff] }
 0x1ac   :  { %v6073_v55 = vpop.f32.mrf.mxu1 }
 0x1ad   :  { %v7450_v56 = vadd.f32 %v6073_v55, %v489_v52  ;;  %v7597_v52 = vld [vmem:[%s8779_s5 + $0x88] sm:$0xff]  ;;  %v7620_v55 = vld [vmem:[%s8779_s5 + $0x20] sm:$0xff] }
 0x1ae   :  { %v572_v57 = vpop.f32.mrf.mxu1 }
 0x1af   :  { %v7452_v58 = vadd.f32 %v572_v57, %v484_v54  ;;  %v7611_v54 = vld [vmem:[%s8779_s5 + $0x80] sm:$0xff]  ;;  %v7634_v57 = vld [vmem:[%s8779_s5 + $0x18] sm:$0xff] }
 0x1b1   :  { %v6123_v1 = vpop.f32.mrf.mxu0 }
 0x1b3   :  { %v911_v3 = vpop.f32.mrf.mxu0 }
 0x1b4   :  { %v6084_v60 = vpop.f32.mrf.mxu1 }
 0x1b5   :  { %v746_v61 = vadd.f32 %v6095_v59, %v6084_v60  ;;  %v7648_v59 = vld [vmem:[%s8779_s5 + $0x10] sm:$0xff]  ;;  %v7653_v60 = vld [vmem:[%s8779_s5 + $0x68] sm:$0xff] }
 0x1b6   :  { %v662_v63 = vpop.f32.mrf.mxu1 }
 0x1b7   :  { %v741_v0 = vadd.f32 %v740_v62, %v662_v63  ;;  %v7667_v62 = vld [vmem:[%s8779_s5 + $0x60] sm:$0xff] }
 0x1b8   :  { %v7676_v63 = vld [vmem:[%s8779_s5] sm:$0xff] }
 0x1bd   :  { %v6106_v2 = vpop.f32.mrf.mxu1 }
 0x1be   :  { %v7454_v4 = vadd.f32 %v6106_v2, %v746_v61  ;;  %v7662_v61 = vld [vmem:[%s8779_s5 + $0x8] sm:$0xff] }
 0x1bf   :  { %v823_v5 = vpop.f32.mrf.mxu1  ;;  %v7705_v2 = vld [vmem:[%s8779_s5 + $0x188] sm:$0xff] }
 0x1c0   :  { %v835_v6 = vmax.f32 %v7450_v56, %v7454_v4  ;;  %v7458_v7 = vadd.f32 %v823_v5, %v741_v0  ;;  %v7625_v56 = vld [vmem:[%s8779_s5 + $0x78] sm:$0xff]  ;;  %v7714_v4 = vld [vmem:[%s8779_s5 + $0x180] sm:$0xff] }
 0x1c1   :  { %v6157_v8 = vpop.f32.mrf.mxu0  ;;  %v7691_v0 = vld [vmem:[%s8779_s5 + $0x58] sm:$0xff] }
 0x1c2   :  { %v834_v9 = vmax.f32 %v7452_v58, %v7458_v7  ;;  %v7639_v58 = vld [vmem:[%s8779_s5 + $0x70] sm:$0xff]  ;;  %v7725_v7 = vld [vmem:[%s8779_s5 + $0xe8] sm:$0xff] }
 0x1c3   :  { %v1079_v10 = vpop.f32.mrf.mxu0 }
 0x1c4   :  { %6188 = vmatprep.mubr.msk.f32.mxu0 %vm322_vm2, %v1079_v10 }
 0x1c5   :  { %6189 = vmatmul.mubr.msk.f32.vlgmr.msra.gmra.mxu0 %vm322_vm2, %v6157_v8 }
 0x1c6   :  { %6203 = vmatpush3.msk.msra.mxu0 %vm329_vm1, %v7187_v16  ;;  %6210 = vmatprep.mubr.msk.f32.mxu0 %vm322_vm2, %v911_v3 }
 0x1c7   :  { %6204 = vmatprep.subr.mxu0 %v7194_v17 }
 0x1c8   :  { %6205 = vmatpush3.msra.mxu0 %v7194_v17 }
 0x1c9   :  { %6206 = vmatprep.subr.mxu0 %v7206_v18 }
 0x1ca   :  { %6207 = vmatpush3.msra.mxu0 %v7206_v18 }
 0x1cb   :  { %6208 = vmatprep.subr.mxu0 %v7220_v20 }
 0x1cc   :  { %6209 = vmatpush3.msra.mxu0 %v7220_v20  ;;  %v6140_v11 = vpop.f32.mrf.mxu1 }
 0x1cd   :  { %6211 = vmatmul.mubr.msk.f32.vlgmr.msra.gmra.mxu0 %vm322_vm2, %v6123_v1  ;;  %6224 = vmatprep.subr.mxu0 %v6973_v13 }
 0x1ce   :  { %v995_v12 = vpop.f32.mrf.mxu1  ;;  %6228 = vmatprep.mubr.msk.f32.mxu0 %vm6974_vm3, %v6973_v13 }
 0x1cf   :  { %6166 = vmatprep.mubr.msk.f32.mxu1 %vm322_vm2, %v995_v12 }
 0x1d0   :  { %6167 = vmatmul.mubr.msk.f32.vlgmr.msra.gmra.mxu1 %vm322_vm2, %v6140_v11 }
 0x1d1   :  { %6170 = vmatpush3.msk.msra.mxu1 %vm329_vm1, %v7226_v21  ;;  %6177 = vmatprep.mubr.msk.f32.mxu1 %vm322_vm2, %v911_v3 }
 0x1d2   :  { %6171 = vmatprep.subr.mxu1 %v7239_v26 }
 0x1d3   :  { %6172 = vmatpush3.msra.mxu1 %v7239_v26 }
 0x1d4   :  { %6173 = vmatprep.subr.mxu1 %v7250_v27 }
 0x1d5   :  { %6174 = vmatpush3.msra.mxu1 %v7250_v27 }
 0x1d6   :  { %6175 = vmatprep.subr.mxu1 %v7258_v28 }
 0x1d7   :  { %6176 = vmatpush3.msra.mxu1 %v7258_v28 }
 0x1d8   :  { %6178 = vmatmul.mubr.msk.f32.vlgmr.msra.gmra.mxu1 %vm322_vm2, %v6123_v1  ;;  %6191 = vmatprep.subr.msk.mxu1 %vm329_vm1, %v7305_v35  ;;  %v7698_v1 = vld [vmem:[%s8779_s5 + $0x50] sm:$0xff] }
 0x1d9   :  { %6192 = vmatpush3.msk.msra.mxu1 %vm329_vm1, %v7305_v35  ;;  %6199 = vmatprep.mubr.msk.f32.mxu1 %vm322_vm2, %v995_v12  ;;  %v7743_v12 = vld [vmem:[%s8779_s5 + $0x170] sm:$0xff] }
 0x1da   :  { %6193 = vmatprep.subr.mxu1 %v7314_v36 }
 0x1db   :  { %6194 = vmatpush3.msra.mxu1 %v7314_v36 }
 0x1dc   :  { %6195 = vmatprep.subr.mxu1 %v7329_v38 }
 0x1dd   :  { %6196 = vmatpush3.msra.mxu1 %v7329_v38 }
 0x1de   :  { %6197 = vmatprep.subr.mxu1 %v7341_v40 }
 0x1df   :  { %6198 = vmatpush3.msra.mxu1 %v7341_v40 }
 0x1e0   :  { %6200 = vmatmul.mubr.msk.f32.vlgmr.msra.gmra.mxu1 %vm322_vm2, %v6140_v11  ;;  %6213 = vmatprep.subr.msk.mxu1 %vm329_vm1, %v7350_v41  ;;  %v7738_v11 = vld [vmem:[%s8779_s5 + $0xe0] sm:$0xff] }
 0x1e1   :  { %6214 = vmatpush3.msk.msra.mxu1 %vm329_vm1, %v7350_v41  ;;  %6221 = vmatprep.mubr.msk.f32.mxu1 %vm322_vm2, %v1079_v10 }
 0x1e2   :  { %6215 = vmatprep.subr.mxu1 %v7363_v42 }
 0x1e3   :  { %6216 = vmatpush3.msra.mxu1 %v7363_v42 }
 0x1e4   :  { %6217 = vmatprep.subr.mxu1 %v7373_v43 }
 0x1e5   :  { %6218 = vmatpush3.msra.mxu1 %v7373_v43  ;;  %v1575_v43 = vld [vmem:[%s8778_s4] sm:$0xf] }
 0x1e6   :  { %6219 = vmatprep.subr.mxu1 %v7382_v44 }
 0x1e7   :  { %6220 = vmatpush3.msra.mxu1 %v7382_v44  ;;  %v5266_v44 = vld [vmem:[%s8778_s4 + $0x8] sm:$0xf] }
 0x1e8   :  { %6222 = vmatmul.mubr.msk.f32.vlgmr.msra.gmra.mxu1 %vm322_vm2, %v6157_v8  ;;  %6238 = vmatprep.subr.mxu1 %v6973_v13  ;;  %v7730_v8 = vld [vmem:[%s8779_s5 + $0x178] sm:$0xff] }
 0x1e9   :  { %6242 = vmatprep.mubr.msk.f32.mxu1 %vm6974_vm3, %v6973_v13 }
 0x285   :  { %v6190_v16 = vpop.f32.mrf.mxu0 }
 0x287   :  { %v1322_v18 = vpop.f32.mrf.mxu0 }
 0x28d   :  { %v6212_v23 = vpop.f32.mrf.mxu0 }
 0x28f   :  { %v1476_v28 = vpop.f32.mrf.mxu0 }
 0x290   :  { %v6168_v14 = vpop.f32.mrf.mxu1 }
 0x292   :  { %v1160_v15 = vpop.f32.mrf.mxu1 }
 0x298   :  { %v6179_v17 = vpop.f32.mrf.mxu1 }
 0x299   :  { %v1247_v20 = vadd.f32 %v6179_v17, %v6168_v14  ;;  %v7766_v17 = vld [vmem:[%s8779_s5 + $0xd0] sm:$0xff] }
 0x29a   :  { %v1241_v19 = vpop.f32.mrf.mxu1 }
 0x29b   :  { %v1242_v22 = vadd.f32 %v1241_v19, %v1160_v15  ;;  %v1332_v24 = vadd.f32 %v6190_v16, %v1247_v20  ;;  %v7752_v15 = vld [vmem:[%s8779_s5 + $0xd8] sm:$0xff]  ;;  %v7757_v16 = vld [vmem:[%s8779_s5 + $0x168] sm:$0xff] }
 0x29c   :  { %v7780_v19 = vld [vmem:[%s8779_s5 + $0xc8] sm:$0xff]  ;;  %v7785_v20 = vld [vmem:[%s8779_s5 + $0x158] sm:$0xff] }
 0x29d   :  { %v1331_v26 = vadd.f32 %v1322_v18, %v1242_v22  ;;  %v1334_v31 = vmax.f32 %v835_v6, %v1332_v24  ;;  %v7771_v18 = vld [vmem:[%s8779_s5 + $0x160] sm:$0xff]  ;;  %v7799_v22 = vld [vmem:[%s8779_s5 + $0x150] sm:$0xff]  ;;  %v7813_v24 = vld [vmem:[%s8779_s5 + $0x148] sm:$0xff] }
 0x29f   :  { %v1333_v36 = vmax.f32 %v834_v9, %v1331_v26  ;;  %v7827_v26 = vld [vmem:[%s8779_s5 + $0x140] sm:$0xff] }
 0x2a0   :  { %v6201_v21 = vpop.f32.mrf.mxu1 }
 0x2a1   :  { %v1482_v27 = vadd.f32 %v6212_v23, %v6201_v21  ;;  %v7794_v21 = vld [vmem:[%s8779_s5 + $0xc0] sm:$0xff]  ;;  %v7808_v23 = vld [vmem:[%s8779_s5 + $0xb8] sm:$0xff] }
 0x2a2   :  { %v1401_v25 = vpop.f32.mrf.mxu1 }
 0x2a3   :  { %v1477_v30 = vadd.f32 %v1476_v28, %v1401_v25  ;;  %v7822_v25 = vld [vmem:[%s8779_s5 + $0xb0] sm:$0xff]  ;;  %v7843_v28 = vld [vmem:[%s8779_s5 + $0x1d8] sm:$0xff] }
 0x2a8   :  { %v6223_v29 = vpop.f32.mrf.mxu1 }
 0x2a9   :  { %v1561_v32 = vadd.f32 %v6223_v29, %v1482_v27  ;;  %v7836_v27 = vld [vmem:[%s8779_s5 + $0xa8] sm:$0xff]  ;;  %v7850_v29 = vld [vmem:[%s8779_s5 + $0xa0] sm:$0xff] }
 0x2aa   :  { %v1551_v34 = vpop.f32.mrf.mxu1 }
 0x2ab   :  { %v1563_v35 = vmax.f32 %v1334_v31, %v1561_v32  ;;  %v1560_v37 = vadd.f32 %v1551_v34, %v1477_v30  ;;  %v7857_v30 = vld [vmem:[%s8779_s5 + $0x1d0] sm:$0xff]  ;;  %v7866_v31 = vld [vmem:[%s8779_s5 + $0x138] sm:$0xff]  ;;  %v7874_v32 = vld [vmem:[%s8779_s5 + $0x1c8] sm:$0xff] }
 0x2ac   :  { %v7889_v34 = vld [vmem:[%s8779_s5 + $0x1c0] sm:$0xff] }
 0x2ad   :  { %v1572_v38 = vadd.f32 %v5260_v33, %v1563_v35  ;;  %v1562_v39 = vmax.f32 %v1333_v36, %v1560_v37  ;;  %v7896_v35 = vld [vmem:[%s8779_s5 + $0x128] sm:$0xff]  ;;  %v7903_v36 = vld [vmem:[%s8779_s5 + $0x1b8] sm:$0xff]  ;;  %v7910_v37 = vld [vmem:[%s8779_s5 + $0x120] sm:$0xff] }
 0x2af   :  { %v7525_v40 = vmax.f32 %v1572_v38, 0.0  ;;  %v1571_v41 = vadd.f32 %v5260_v33, %v1562_v39  ;;  %v7882_v33 = vld [vmem:[%s8779_s5 + $0x130] sm:$0xff]  ;;  %v7924_v39 = vld [vmem:[%s8779_s5 + $0x118] sm:$0xff] }
 0x2b0   :  { %v7917_v38 = vld [vmem:[%s8779_s5 + $0x1b0] sm:$0xff] }
 0x2b1   :  { %v7527_v42 = vmax.f32 %v1571_v41, 0.0  ;;  %6225 = vmatpush3.msk.msra.mxu0 %vm1580_vm4, %v7525_v40  ;;  %6239 = vmatpush3.msk.msra.mxu1 %vm1580_vm4, %v7525_v40  ;;  %v7931_v41 = vld [vmem:[%s8779_s5 + $0x1a8] sm:$0xff] }
 0x2b2   :  { %6226 = vmatprep.subr.mxu0 %v6973_v13  ;;  %6240 = vmatprep.subr.mxu1 %v6973_v13 }
 0x2b3   :  { %6227 = vmatpush3.msra.mxu0 %v7527_v42  ;;  %6241 = vmatpush3.msra.mxu1 %v7527_v42 }
 0x2b4   :  { %6229 = vmatmul.mubr.msk.f32.vlgmr.msra.gmra.mxu0 %vm1576_vm5, %v1575_v43  ;;  %6231 = vmatprep.subr.mxu0 %v6973_v13  ;;  %v7938_v43 = vld [vmem:[%s8779_s5 + $0x110] sm:$0xff] }
 0x2b5   :  { %6232 = vmatpush3.msk.msra.mxu0 %vm1580_vm4, %v7525_v40  ;;  %6235 = vmatprep.mubr.msk.f32.mxu0 %vm6974_vm3, %v6973_v13 }
 0x2b6   :  { %6233 = vmatprep.subr.mxu0 %v6973_v13  ;;  %6243 = vmatmul.mubr.msk.f32.vlgmr.msra.gmra.mxu1 %vm1576_vm5, %v5266_v44  ;;  %v7945_v44 = vld [vmem:[%s8779_s5 + $0x1a0] sm:$0xff] }
 0x2b7   :  { %6234 = vmatpush3.msra.mxu0 %v7527_v42  ;;  %6268 = vmatprep.subr.mxu1 %v6973_v13 }
 0x2b8   :  { %6236 = vmatmul.mubr.msk.f32.vlgmr.msra.gmra.mxu0 %vm1576_vm5, %v5263_v45  ;;  %6269 = vmatpush3.msra.mxu1 %v7555_v46  ;;  %v7952_v45 = vld [vmem:[%s8779_s5 + $0x108] sm:$0xff] }
 0x2b9   :  { %6270 = vmatprep.subr.mxu1 %v6973_v13  ;;  %6245 = vmatprep.subr.mxu0 %v6973_v13 }
 0x2ba   :  { %6271 = vmatpush3.msra.mxu1 %v7564_v47  ;;  %6246 = vmatpush3.msra.mxu0 %v7569_v48 }
 0x2bb   :  { %6272 = vmatprep.subr.mxu1 %v6973_v13  ;;  %6247 = vmatprep.subr.mxu0 %v6973_v13 }
 0x2bc   :  { %6273 = vmatpush3.msra.mxu1 %v7578_v49  ;;  %6248 = vmatpush3.msra.mxu0 %v7583_v50 }
 0x2bd   :  { %6274 = vmatprep.subr.mxu1 %v6973_v13  ;;  %6249 = vmatprep.subr.mxu0 %v6973_v13 }
 0x2be   :  { %6275 = vmatpush3.msra.mxu1 %v7592_v51  ;;  %6250 = vmatpush3.msra.mxu0 %v7597_v52 }
 0x2bf   :  { %6276 = vmatprep.subr.mxu1 %v6973_v13  ;;  %6251 = vmatprep.subr.mxu0 %v6973_v13 }
 0x2c0   :  { %6277 = vmatpush3.msra.mxu1 %v7606_v53  ;;  %6252 = vmatpush3.msra.mxu0 %v7611_v54 }
 0x2c1   :  { %6278 = vmatprep.subr.mxu1 %v6973_v13  ;;  %6253 = vmatprep.subr.mxu0 %v6973_v13 }
 0x2c2   :  { %6279 = vmatpush3.msra.mxu1 %v7620_v55  ;;  %6254 = vmatpush3.msra.mxu0 %v7625_v56 }
 0x2c3   :  { %6280 = vmatprep.subr.mxu1 %v6973_v13  ;;  %6255 = vmatprep.subr.mxu0 %v6973_v13 }
 0x2c4   :  { %6281 = vmatpush3.msra.mxu1 %v7634_v57  ;;  %6256 = vmatpush3.msra.mxu0 %v7639_v58 }
 0x2c5   :  { %6282 = vmatprep.subr.mxu1 %v6973_v13  ;;  %6257 = vmatprep.subr.mxu0 %v6973_v13 }
 0x2c6   :  { %6283 = vmatpush3.msra.mxu1 %v7648_v59  ;;  %6258 = vmatpush3.msra.mxu0 %v7653_v60 }
 0x2c7   :  { %6284 = vmatprep.subr.mxu1 %v6973_v13  ;;  %6259 = vmatprep.subr.mxu0 %v6973_v13 }
 0x2c8   :  { %6285 = vmatpush3.msra.mxu1 %v7662_v61  ;;  %6260 = vmatpush3.msra.mxu0 %v7667_v62 }
 0x2c9   :  { %6286 = vmatprep.subr.mxu1 %v6973_v13  ;;  %6261 = vmatprep.subr.mxu0 %v6973_v13 }
 0x2ca   :  { %6287 = vmatpush3.msra.mxu1 %v7676_v63  ;;  %6288 = vmatprep.mubr.msk.f32.mxu1 %vm6974_vm3, %v6973_v13 }
 0x2cb   :  { %6314 = vmatprep.subr.mxu1 %v6973_v13  ;;  %6265 = vmatprep.mubr.msk.f32.mxu0 %vm6974_vm3, %v6973_v13 }
 0x2cc   :  { %6262 = vmatpush3.msra.mxu0 %v7691_v0 }
 0x2cd   :  { %6263 = vmatprep.subr.mxu0 %v6973_v13 }
 0x2ce   :  { %6264 = vmatpush3.msra.mxu0 %v7698_v1 }
 0x2cf   :  { %6291 = vmatprep.subr.mxu0 %v6973_v13 }
 0x374   :  { %v7707_v3 = vpop.f32.mrf.mxu0 }
 0x375   :  { %6289 = vmatmul.mubr.msk.f32.vlgmr.msra.gmra.mxu1 %vm1825_vm6, %v7707_v3 }
 0x376   :  { %6315 = vmatpush3.msra.mxu1 %v7705_v2  ;;  %v6230_v5 = vpop.f32.mrf.mxu0  ;;  %6334 = vmatprep.mubr.msk.f32.mxu1 %vm6974_vm3, %v6973_v13  ;;  %v7719_v6 = vpop.f32.mrf.mxu1 }
 0x377   :  { %6316 = vmatprep.subr.mxu1 %v6973_v13  ;;  %v7959_v5 = vld [vmem:[%s8779_s5 + $0x198] sm:$0xff] }
 0x378   :  { %6317 = vmatpush3.msra.mxu1 %v7714_v4  ;;  %v1725_v9 = vpop.f32.mrf.mxu0  ;;  %v6244_v10 = vpop.f32.mrf.mxu1  ;;  %8796 = vst [vmem:[#allocation5_spill] sm:$0xff] %v7959_v5 }
 0x379   :  { %6318 = vmatprep.subr.mxu1 %v6973_v13  ;;  %6266 = vmatmul.mubr.msk.f32.vlgmr.msra.gmra.mxu0 %vm1825_vm6, %v1725_v9  ;;  %v7973_v10 = vld [vmem:[%s8779_s5 + $0x190] sm:$0xff] }
 0x37a   :  { %6292 = vmatpush3.msra.mxu0 %v7725_v7  ;;  %6319 = vmatpush3.msra.mxu1 %v7730_v8  ;;  %v6237_v14 = vpop.f32.mrf.mxu0  ;;  %8797 = vst [vmem:[#allocation6_spill] sm:$0xff] %v7973_v10 }
 0x37b   :  { %6293 = vmatprep.subr.mxu0 %v6973_v13  ;;  %6320 = vmatprep.subr.mxu1 %v6973_v13  ;;  %v7982_v14 = vld [vmem:[%s8779_s5 + $0xf8] sm:$0xff] }
 0x37c   :  { %6294 = vmatpush3.msra.mxu0 %v7738_v11  ;;  %6321 = vmatpush3.msra.mxu1 %v7743_v12 }
 0x37d   :  { %6295 = vmatprep.subr.mxu0 %v6973_v13  ;;  %6322 = vmatprep.subr.mxu1 %v6973_v13 }
 0x37e   :  { %6296 = vmatpush3.msra.mxu0 %v7752_v15  ;;  %6323 = vmatpush3.msra.mxu1 %v7757_v16 }
 0x37f   :  { %6297 = vmatprep.subr.mxu0 %v6973_v13  ;;  %6324 = vmatprep.subr.mxu1 %v6973_v13 }
 0x380   :  { %6298 = vmatpush3.msra.mxu0 %v7766_v17  ;;  %6325 = vmatpush3.msra.mxu1 %v7771_v18 }
 0x381   :  { %6299 = vmatprep.subr.mxu0 %v6973_v13  ;;  %6326 = vmatprep.subr.mxu1 %v6973_v13 }
 0x382   :  { %6300 = vmatpush3.msra.mxu0 %v7780_v19  ;;  %6327 = vmatpush3.msra.mxu1 %v7785_v20 }
 0x383   :  { %6301 = vmatprep.subr.mxu0 %v6973_v13  ;;  %6328 = vmatprep.subr.mxu1 %v6973_v13 }
 0x384   :  { %6302 = vmatpush3.msra.mxu0 %v7794_v21  ;;  %6329 = vmatpush3.msra.mxu1 %v7799_v22 }
 0x385   :  { %6303 = vmatprep.subr.mxu0 %v6973_v13  ;;  %6330 = vmatprep.subr.mxu1 %v6973_v13 }
 0x386   :  { %6304 = vmatpush3.msra.mxu0 %v7808_v23  ;;  %6331 = vmatpush3.msra.mxu1 %v7813_v24 }
 0x387   :  { %6305 = vmatprep.subr.mxu0 %v6973_v13  ;;  %6332 = vmatprep.subr.mxu1 %v6973_v13 }
 0x388   :  { %6306 = vmatpush3.msra.mxu0 %v7822_v25  ;;  %6333 = vmatpush3.msra.mxu1 %v7827_v26 }
 0x389   :  { %6307 = vmatprep.subr.mxu0 %v6973_v13  ;;  %6335 = vmatmul.mubr.msk.f32.vlgmr.msra.gmra.mxu1 %vm1825_vm6, %v1725_v9  ;;  %v7966_v9 = vld [vmem:[%s8779_s5 + $0x100] sm:$0xff] }
 0x38a   :  { %6360 = vmatprep.subr.mxu1 %v6973_v13  ;;  %6308 = vmatpush3.msra.mxu0 %v7836_v27 }
 0x38b   :  { %6361 = vmatpush3.msra.mxu1 %v7843_v28  ;;  %6309 = vmatprep.subr.mxu0 %v6973_v13 }
 0x38c   :  { %6362 = vmatprep.subr.mxu1 %v6973_v13  ;;  %6310 = vmatpush3.msra.mxu0 %v7850_v29 }
 0x38d   :  { %6311 = vmatprep.mubr.msk.f32.mxu0 %vm6974_vm3, %v6973_v13  ;;  %6363 = vmatpush3.msra.mxu1 %v7857_v30 }
 0x38e   :  { %6312 = vmatmul.mubr.msk.f32.vlgmr.msra.gmra.mxu0 %vm1825_vm6, %v7719_v6  ;;  %6337 = vmatprep.subr.mxu0 %v6973_v13 }
 0x38f   :  { %6364 = vmatprep.subr.mxu1 %v6973_v13  ;;  %6338 = vmatpush3.msra.mxu0 %v7866_v31 }
 0x390   :  { %6365 = vmatpush3.msra.mxu1 %v7874_v32  ;;  %6339 = vmatprep.subr.mxu0 %v6973_v13 }
 0x391   :  { %6366 = vmatprep.subr.mxu1 %v6973_v13  ;;  %6340 = vmatpush3.msra.mxu0 %v7882_v33 }
 0x392   :  { %6367 = vmatpush3.msra.mxu1 %v7889_v34  ;;  %6341 = vmatprep.subr.mxu0 %v6973_v13 }
 0x393   :  { %6368 = vmatprep.subr.mxu1 %v6973_v13  ;;  %6342 = vmatpush3.msra.mxu0 %v7896_v35 }
 0x394   :  { %6369 = vmatpush3.msra.mxu1 %v7903_v36  ;;  %6343 = vmatprep.subr.mxu0 %v6973_v13 }
 0x395   :  { %6370 = vmatprep.subr.mxu1 %v6973_v13  ;;  %6344 = vmatpush3.msra.mxu0 %v7910_v37 }
 0x396   :  { %6371 = vmatpush3.msra.mxu1 %v7917_v38  ;;  %6345 = vmatprep.subr.mxu0 %v6973_v13 }
 0x397   :  { %6372 = vmatprep.subr.mxu1 %v6973_v13  ;;  %6346 = vmatpush3.msra.mxu0 %v7924_v39 }
 0x398   :  { %6373 = vmatpush3.msra.mxu1 %v7931_v41  ;;  %6347 = vmatprep.subr.mxu0 %v6973_v13 }
 0x399   :  { %6374 = vmatprep.subr.mxu1 %v6973_v13  ;;  %6348 = vmatpush3.msra.mxu0 %v7938_v43 }
 0x39a   :  { %6375 = vmatpush3.msra.mxu1 %v7945_v44  ;;  %6349 = vmatprep.subr.mxu0 %v6973_v13 }
 0x39b   :  { %6376 = vmatprep.subr.mxu1 %v6973_v13  ;;  %6350 = vmatpush3.msra.mxu0 %v7952_v45 }
 0x39c   :  { %6377 = vmatpush3.msra.mxu1 %v7959_v5  ;;  %6351 = vmatprep.subr.mxu0 %v6973_v13  ;;  %v7993_v5 = vld [vmem:[%s8779_s5 + $0xf0] sm:$0xff] }
 0x39d   :  { %6378 = vmatprep.subr.mxu1 %v6973_v13  ;;  %6352 = vmatpush3.msra.mxu0 %v7966_v9 }
 0x39e   :  { %6379 = vmatpush3.msra.mxu1 %v7973_v10  ;;  %6380 = vmatprep.mubr.msk.f32.mxu1 %vm6974_vm3, %v6973_v13  ;;  %v5325_v10 = vld [vmem:[%s8778_s4 + $0xc] sm:$0xf] }
 0x39f   :  { %6353 = vmatprep.subr.mxu0 %v6973_v13  ;;  %6381 = vmatmul.mubr.msk.f32.vlgmr.msra.gmra.mxu1 %vm1825_vm6, %v7719_v6  ;;  %v5328_v6 = vld [vmem:[%s8778_s4 + $0x10] sm:$0xf] }
 0x3a0   :  { %6390 = vmatprep.subr.mxu1 %v6973_v13  ;;  %6354 = vmatpush3.msra.mxu0 %v7982_v14 }
 0x3a1   :  { %6391 = vmatpush3.msk.msra.mxu1 %vm1580_vm4, %v7525_v40  ;;  %6355 = vmatprep.subr.mxu0 %v6973_v13 }
 0x3a2   :  { %6392 = vmatprep.subr.mxu1 %v6973_v13  ;;  %6356 = vmatpush3.msra.mxu0 %v7993_v5 }
 0x3a3   :  { %6357 = vmatprep.mubr.msk.f32.mxu0 %vm6974_vm3, %v6973_v13  ;;  %6393 = vmatpush3.msra.mxu1 %v7527_v42 }
 0x3a4   :  { %6394 = vmatprep.mubr.msk.f32.mxu1 %vm6974_vm3, %v6973_v13  ;;  %6358 = vmatmul.mubr.msk.f32.vlgmr.msra.gmra.mxu0 %vm1825_vm6, %v7707_v3  ;;  %v5331_v3 = vld [vmem:[%s8778_s4 + $0x14] sm:$0xf] }
 0x3a5   :  { %6383 = vmatprep.subr.mxu0 %v6973_v13  ;;  %6395 = vmatmul.mubr.msk.f32.vlgmr.msra.gmra.mxu1 %vm1576_vm5, %v5328_v6  ;;  %v5360_v6 = vld [vmem:[%s8782_s8 + $0x20] sm:$0xff] }
 0x3a6   :  { %6384 = vmatpush3.msk.msra.mxu0 %vm1580_vm4, %v7525_v40  ;;  %6387 = vmatprep.mubr.msk.f32.mxu0 %vm6974_vm3, %v6973_v13 }
 0x3a7   :  { %6385 = vmatprep.subr.mxu0 %v6973_v13  ;;  %6404 = vmatprep.subr.mxu1 %v6973_v13 }
 0x3a8   :  { %6386 = vmatpush3.msra.mxu0 %v7527_v42  ;;  %6405 = vmatpush3.msra.mxu1 %v7569_v48 }
 0x3a9   :  { %6388 = vmatmul.mubr.msk.f32.vlgmr.msra.gmra.mxu0 %vm1576_vm5, %v5325_v10  ;;  %6397 = vmatprep.subr.mxu0 %v6973_v13 }
 0x3aa   :  { %6398 = vmatpush3.msk.msra.mxu0 %vm1580_vm4, %v7525_v40  ;;  %6401 = vmatprep.mubr.msk.f32.mxu0 %vm6974_vm3, %v6973_v13 }
 0x3ab   :  { %6399 = vmatprep.subr.mxu0 %v6973_v13  ;;  %6406 = vmatprep.subr.mxu1 %v6973_v13 }
 0x3ac   :  { %6400 = vmatpush3.msra.mxu0 %v7527_v42  ;;  %6407 = vmatpush3.msra.mxu1 %v7583_v50 }
 0x3ad   :  { %6402 = vmatmul.mubr.msk.f32.vlgmr.msra.gmra.mxu0 %vm1576_vm5, %v5331_v3  ;;  %6408 = vmatprep.subr.mxu1 %v6973_v13 }
 0x3ae   :  { %6427 = vmatprep.subr.mxu0 %v6973_v13  ;;  %6409 = vmatpush3.msra.mxu1 %v7597_v52 }
 0x3af   :  { %6428 = vmatpush3.msra.mxu0 %v7555_v46  ;;  %6410 = vmatprep.subr.mxu1 %v6973_v13 }
 0x3b0   :  { %6429 = vmatprep.subr.mxu0 %v6973_v13  ;;  %6411 = vmatpush3.msra.mxu1 %v7611_v54 }
 0x3b1   :  { %6430 = vmatpush3.msra.mxu0 %v7564_v47  ;;  %6412 = vmatprep.subr.mxu1 %v6973_v13 }
 0x3b2   :  { %6431 = vmatprep.subr.mxu0 %v6973_v13  ;;  %6413 = vmatpush3.msra.mxu1 %v7625_v56 }
 0x3b3   :  { %6432 = vmatpush3.msra.mxu0 %v7578_v49  ;;  %6414 = vmatprep.subr.mxu1 %v6973_v13 }
 0x3b4   :  { %6433 = vmatprep.subr.mxu0 %v6973_v13  ;;  %6415 = vmatpush3.msra.mxu1 %v7639_v58 }
 0x3b5   :  { %6434 = vmatpush3.msra.mxu0 %v7592_v51  ;;  %6416 = vmatprep.subr.mxu1 %v6973_v13 }
 0x3b6   :  { %6435 = vmatprep.subr.mxu0 %v6973_v13  ;;  %6417 = vmatpush3.msra.mxu1 %v7653_v60 }
 0x3b7   :  { %6436 = vmatpush3.msra.mxu0 %v7606_v53  ;;  %6418 = vmatprep.subr.mxu1 %v6973_v13 }
 0x3b8   :  { %6437 = vmatprep.subr.mxu0 %v6973_v13  ;;  %6419 = vmatpush3.msra.mxu1 %v7667_v62 }
 0x3b9   :  { %6438 = vmatpush3.msra.mxu0 %v7620_v55  ;;  %6420 = vmatprep.subr.mxu1 %v6973_v13 }
 0x3ba   :  { %6439 = vmatprep.subr.mxu0 %v6973_v13  ;;  %6421 = vmatpush3.msra.mxu1 %v7691_v0 }
 0x3bb   :  { %6440 = vmatpush3.msra.mxu0 %v7634_v57  ;;  %6422 = vmatprep.subr.mxu1 %v6973_v13 }
 0x3bc   :  { %6441 = vmatprep.subr.mxu0 %v6973_v13  ;;  %6423 = vmatpush3.msra.mxu1 %v7698_v1 }
 0x3bd   :  { %6442 = vmatpush3.msra.mxu0 %v7648_v59  ;;  %6424 = vmatprep.mubr.msk.f32.mxu1 %vm6974_vm3, %v6973_v13 }
 0x3be   :  { %6443 = vmatprep.subr.mxu0 %v6973_v13  ;;  %6450 = vmatprep.subr.mxu1 %v6973_v13 }
 0x3bf   :  { %6444 = vmatpush3.msra.mxu0 %v7662_v61  ;;  %6447 = vmatprep.mubr.msk.f32.mxu0 %vm6974_vm3, %v6973_v13 }
 0x3c0   :  { %6445 = vmatprep.subr.mxu0 %v6973_v13 }
 0x3c1   :  { %6446 = vmatpush3.msra.mxu0 %v7676_v63 }
 0x3c2   :  { %6473 = vmatprep.subr.mxu0 %v6973_v13 }
 0x435   :  { %v1968_v40 = vpop.f32.mrf.mxu1 }
 0x437   :  { %v6290_v42 = vpop.f32.mrf.mxu1 }
 0x438   :  { %v3489_v42 = vld [vmem:[%s8784_s10] sm:$0xff] }
 0x439   :  { %v1895_v46 = vpop.f32.mrf.mxu0 }
 0x43a   :  { %v1969_v47 = vadd.f32 %v1968_v40, %v1895_v46  ;;  %v5370_v46 = vld [vmem:[%s8784_s10 + $0x20] sm:$0xff] }
 0x43b   :  { %v6267_v48 = vpop.f32.mrf.mxu0 }
 0x449   :  { %v2145_v49 = vpop.f32.mrf.mxu1 }
 0x44b   :  { %v6336_v50 = vpop.f32.mrf.mxu1 }
 0x44e   :  { %v2052_v51 = vpop.f32.mrf.mxu0 }
 0x44f   :  { %v8081_v52 = vadd.f32 %v2052_v51, %v1969_v47 }
 0x450   :  { %v6313_v53 = vpop.f32.mrf.mxu0 }
 0x451   :  { %v5364_v53 = vld [vmem:[%s8783_s9] ss:$0 sm:$0xff] }
 0x45f   :  { %v2296_v54 = vpop.f32.mrf.mxu1 }
 0x461   :  { %v6382_v55 = vpop.f32.mrf.mxu1 }
 0x464   :  { %v2215_v56 = vpop.f32.mrf.mxu0 }
 0x465   :  { %v2216_v57 = vadd.f32 %v2215_v56, %v2145_v49  ;;  %v2448_v58 = vpop.f32.mrf.mxu1 }
 0x466   :  { %6425 = vmatmul.mubr.msk.f32.vlgmr.msra.gmra.mxu1 %vm1825_vm6, %v2448_v58  ;;  %v6359_v59 = vpop.f32.mrf.mxu0 }
 0x467   :  { %v8084_v60 = vadd.f32 %v2296_v54, %v2216_v57  ;;  %6451 = vmatpush3.msra.mxu1 %v7725_v7  ;;  %v6396_v61 = vpop.f32.mrf.mxu1  ;;  %6470 = vmatprep.mubr.msk.f32.mxu1 %vm6974_vm3, %v6973_v13  ;;  %v8799_v7 = vld [vmem:[#allocation6_spill] sm:$0xff] }
 0x468   :  { %6452 = vmatprep.subr.mxu1 %v6973_v13 }
 0x469   :  { %6453 = vmatpush3.msra.mxu1 %v7738_v11  ;;  %v8091_v62 = vpop.f32.mrf.mxu0  ;;  %v2301_v63 = vmax.f32 %v8081_v52, %v8084_v60  ;;  %v5344_v11 = vld [vmem:[%s8781_s7 + $0x10] sm:$0xff] }
 0x46a   :  { %6454 = vmatprep.subr.mxu1 %v6973_v13  ;;  %6448 = vmatmul.mubr.msk.f32.vlgmr.msra.gmra.mxu0 %vm1825_vm6, %v8091_v62 }
 0x46b   :  { %6455 = vmatpush3.msra.mxu1 %v7752_v15  ;;  %6474 = vmatpush3.msra.mxu0 %v7705_v2  ;;  %v6389_v0 = vpop.f32.mrf.mxu0 }
 0x46c   :  { %6456 = vmatprep.subr.mxu1 %v6973_v13  ;;  %6475 = vmatprep.subr.mxu0 %v6973_v13  ;;  %v3491_v0 = vld [vmem:[%s8784_s10 + $0x10] sm:$0xff] }
 0x46d   :  { %6457 = vmatpush3.msra.mxu1 %v7766_v17  ;;  %6476 = vmatpush3.msra.mxu0 %v7714_v4  ;;  %v8104_v1 = vpop.f32.mrf.mxu0  ;;  %v8798_v4 = vld [vmem:[#allocation5_spill] sm:$0xff] }
 0x46e   :  { %6458 = vmatprep.subr.mxu1 %v6973_v13  ;;  %6477 = vmatprep.subr.mxu0 %v6973_v13 }
 0x46f   :  { %6459 = vmatpush3.msra.mxu1 %v7780_v19  ;;  %6478 = vmatpush3.msra.mxu0 %v7730_v8  ;;  %v6403_v2 = vpop.f32.mrf.mxu0  ;;  %v2969_v8 = vld [vmem:[%s8781_s7] sm:$0xff] }
 0x470   :  { %6460 = vmatprep.subr.mxu1 %v6973_v13  ;;  %6479 = vmatprep.subr.mxu0 %v6973_v13  ;;  %v5379_v2 = vld [vmem:[%s8784_s10 + $0x40] sm:$0xff] }
 0x471   :  { %6461 = vmatpush3.msra.mxu1 %v7794_v21  ;;  %6480 = vmatpush3.msra.mxu0 %v7743_v12 }
 0x472   :  { %6462 = vmatprep.subr.mxu1 %v6973_v13  ;;  %6481 = vmatprep.subr.mxu0 %v6973_v13 }
 0x473   :  { %6463 = vmatpush3.msra.mxu1 %v7808_v23  ;;  %6482 = vmatpush3.msra.mxu0 %v7757_v16 }
 0x474   :  { %6464 = vmatprep.subr.mxu1 %v6973_v13  ;;  %6483 = vmatprep.subr.mxu0 %v6973_v13 }
 0x475   :  { %6465 = vmatpush3.msra.mxu1 %v7822_v25  ;;  %6484 = vmatpush3.msra.mxu0 %v7771_v18 }
 0x476   :  { %6466 = vmatprep.subr.mxu1 %v6973_v13  ;;  %6485 = vmatprep.subr.mxu0 %v6973_v13 }
 0x477   :  { %6467 = vmatpush3.msra.mxu1 %v7836_v27  ;;  %6486 = vmatpush3.msra.mxu0 %v7785_v20 }
 0x478   :  { %6468 = vmatprep.subr.mxu1 %v6973_v13  ;;  %6487 = vmatprep.subr.mxu0 %v6973_v13 }
 0x479   :  { %6469 = vmatpush3.msra.mxu1 %v7850_v29  ;;  %6488 = vmatpush3.msra.mxu0 %v7799_v22 }
 0x47a   :  { %6471 = vmatmul.mubr.msk.f32.vlgmr.msra.gmra.mxu1 %vm1825_vm6, %v8104_v1  ;;  %6489 = vmatprep.subr.mxu0 %v6973_v13 }
 0x47b   :  { %6496 = vmatprep.subr.mxu1 %v6973_v13  ;;  %6490 = vmatpush3.msra.mxu0 %v7813_v24 }
 0x47c   :  { %6497 = vmatpush3.msra.mxu1 %v7866_v31  ;;  %6491 = vmatprep.subr.mxu0 %v6973_v13 }
 0x47d   :  { %6498 = vmatprep.subr.mxu1 %v6973_v13  ;;  %6492 = vmatpush3.msra.mxu0 %v7827_v26 }
 0x47e   :  { %6493 = vmatprep.mubr.msk.f32.mxu0 %vm6974_vm3, %v6973_v13  ;;  %6499 = vmatpush3.msra.mxu1 %v7882_v33 }
 0x47f   :  { %6494 = vmatmul.mubr.msk.f32.vlgmr.msra.gmra.mxu0 %vm1825_vm6, %v2448_v58  ;;  %6500 = vmatprep.subr.mxu1 %v6973_v13 }
 0x480   :  { %6519 = vmatprep.subr.mxu0 %v6973_v13  ;;  %6501 = vmatpush3.msra.mxu1 %v7896_v35  ;;  %v2970_v35 = vld [vmem:[%s8781_s7 + $0x8] sm:$0x3] }
 0x481   :  { %6520 = vmatpush3.msra.mxu0 %v7843_v28  ;;  %6502 = vmatprep.subr.mxu1 %v6973_v13 }
 0x482   :  { %6521 = vmatprep.subr.mxu0 %v6973_v13  ;;  %6503 = vmatpush3.msra.mxu1 %v7910_v37  ;;  %v5349_v37 = vld [vmem:[%s8781_s7 + $0x20] sm:$0xff] }
 0x483   :  { %6522 = vmatpush3.msra.mxu0 %v7857_v30  ;;  %6504 = vmatprep.subr.mxu1 %v6973_v13  ;;  %v5340_v30 = vld [vmem:[%s8780_s6] ss:$0 sm:$0xff] }
 0x484   :  { %6523 = vmatprep.subr.mxu0 %v6973_v13  ;;  %6505 = vmatpush3.msra.mxu1 %v7924_v39  ;;  %v5355_v39 = vld [vmem:[%s8782_s8 + $0x18] sm:$0xff] }
 0x485   :  { %6524 = vmatpush3.msra.mxu0 %v7874_v32  ;;  %6506 = vmatprep.subr.mxu1 %v6973_v13 }
 0x486   :  { %6525 = vmatprep.subr.mxu0 %v6973_v13  ;;  %6507 = vmatpush3.msra.mxu1 %v7938_v43  ;;  %v5354_v43 = vld [vmem:[%s8782_s8 + $0x10] sm:$0xff] }
 0x487   :  { %6526 = vmatpush3.msra.mxu0 %v7889_v34  ;;  %6508 = vmatprep.subr.mxu1 %v6973_v13 }
 0x488   :  { %6527 = vmatprep.subr.mxu0 %v6973_v13  ;;  %6509 = vmatpush3.msra.mxu1 %v7952_v45  ;;  %v5361_v45 = vld [vmem:[%s8782_s8 + $0x28] sm:$0xff] }
 0x489   :  { %6528 = vmatpush3.msra.mxu0 %v7903_v36  ;;  %6510 = vmatprep.subr.mxu1 %v6973_v13  ;;  %v5345_v36 = vld [vmem:[%s8781_s7 + $0x18] sm:$0x3] }
 0x48a   :  { %6529 = vmatprep.subr.mxu0 %v6973_v13  ;;  %6511 = vmatpush3.msra.mxu1 %v7966_v9 }
 0x48b   :  { %6530 = vmatpush3.msra.mxu0 %v7917_v38  ;;  %6512 = vmatprep.subr.mxu1 %v6973_v13  ;;  %v5350_v38 = vld [vmem:[%s8781_s7 + $0x28] sm:$0x3] }
 0x48c   :  { %6531 = vmatprep.subr.mxu0 %v6973_v13  ;;  %6513 = vmatpush3.msra.mxu1 %v7982_v14 }
 0x48d   :  { %6532 = vmatpush3.msra.mxu0 %v7931_v41  ;;  %6514 = vmatprep.subr.mxu1 %v6973_v13  ;;  %v3225_v41 = vld [vmem:[%s8782_s8 + $0x8] sm:$0xff] }
 0x48e   :  { %6533 = vmatprep.subr.mxu0 %v6973_v13  ;;  %6515 = vmatpush3.msra.mxu1 %v7993_v5 }
 0x48f   :  { %6516 = vmatprep.mubr.msk.f32.mxu1 %vm6974_vm3, %v6973_v13  ;;  %6534 = vmatpush3.msra.mxu0 %v7945_v44  ;;  %v3224_v44 = vld [vmem:[%s8782_s8] sm:$0xff] }
 0x490   :  { %6517 = vmatmul.mubr.msk.f32.vlgmr.msra.gmra.mxu1 %vm1825_vm6, %v8091_v62  ;;  %6535 = vmatprep.subr.mxu0 %v6973_v13  ;;  %v3490_v62 = vld [vmem:[%s8784_s10 + $0x8] sm:$0xff] }
 0x491   :  { %6536 = vmatpush3.msra.mxu0 %v8798_v4  ;;  %6539 = vmatprep.mubr.msk.f32.mxu0 %vm6974_vm3, %v6973_v13  ;;  %v5372_v4 = vld [vmem:[%s8784_s10 + $0x30] sm:$0xff] }
 0x492   :  { %6537 = vmatprep.subr.mxu0 %v6973_v13  ;;  %6544 = vmatprep.mubr.msk.f32.mxu1 %vm2971_vm7, %v2969_v8  ;;  %v5373_v8 = vld [vmem:[%s8784_s10 + $0x38] sm:$0x3f] }
 0x493   :  { %6538 = vmatpush3.msra.mxu0 %v8799_v7  ;;  %v5415_v7 = vld [vmem:[%s8785_s11 + $0x98] sm:$0xff] }
 0x494   :  { %6540 = vmatmul.mubr.msk.f32.vlgmr.msra.gmra.mxu0 %vm1825_vm6, %v8104_v1  ;;  %v3492_v1 = vld [vmem:[%s8784_s10 + $0x18] sm:$0x3f] }
 0x495   :  { %6549 = vmatprep.mubr.msk.f32.mxu0 %vm2971_vm7, %v5344_v11  ;;  %v5380_v11 = vld [vmem:[%s8784_s10 + $0x48] sm:$0xff] }
 0x526   :  { %v2596_v12 = vpop.f32.mrf.mxu1 }
 0x528   :  { %v6426_v15 = vpop.f32.mrf.mxu1 }
 0x529   :  { %v5381_v15 = vld [vmem:[%s8784_s10 + $0x50] sm:$0xff] }
 0x52a   :  { %v2669_v16 = vpop.f32.mrf.mxu0 }
 0x52b   :  { %v2670_v22 = vadd.f32 %v2669_v16, %v2596_v12  ;;  %v5388_v12 = vld [vmem:[%s8784_s10 + $0x60] sm:$0xff]  ;;  %v5389_v16 = vld [vmem:[%s8784_s10 + $0x68] sm:$0xff] }
 0x52c   :  { %v6449_v17 = vpop.f32.mrf.mxu0 }
 0x52d   :  { %v5382_v17 = vld [vmem:[%s8784_s10 + $0x58] sm:$0x3f] }
 0x53a   :  { %v2742_v18 = vpop.f32.mrf.mxu1 }
 0x53b   :  { %v2746_v24 = vadd.f32 %v2742_v18, %v2670_v22  ;;  %v5390_v18 = vld [vmem:[%s8784_s10 + $0x70] sm:$0xff]  ;;  %v5391_v22 = vld [vmem:[%s8784_s10 + $0x78] sm:$0x3f] }
 0x53c   :  { %v6472_v19 = vpop.f32.mrf.mxu1 }
 0x53d   :  { %v2747_v28 = vmax.f32 %v2301_v63, %v2746_v24  ;;  %v5371_v63 = vld [vmem:[%s8784_s10 + $0x28] sm:$0xff]  ;;  %v5397_v19 = vld [vmem:[%s8784_s10 + $0x80] sm:$0xff]  ;;  %v5399_v24 = vld [vmem:[%s8784_s10 + $0x90] sm:$0xff] }
 0x53f   :  { %v2814_v20 = vpop.f32.mrf.mxu0 }
 0x541   :  { %v6495_v21 = vpop.f32.mrf.mxu0 }
 0x542   :  { %v5414_v21 = vld [vmem:[%s8785_s11 + $0x90] sm:$0xff] }
 0x550   :  { %v2884_v23 = vpop.f32.mrf.mxu1 }
 0x551   :  { %v2885_v26 = vadd.f32 %v2884_v23, %v2814_v20  ;;  %v4010_v20 = vld [vmem:[%s8785_s11 + $0x48] sm:$0xff] }
 0x552   :  { %v6518_v25 = vpop.f32.mrf.mxu1  ;;  %v5398_v23 = vld [vmem:[%s8784_s10 + $0x88] sm:$0xff] }
 0x553   :  { %v4009_v25 = vld [vmem:[%s8785_s11 + $0x40] sm:$0xff] }
 0x554   :  { %v2954_v27 = vpop.f32.mrf.mxu0 }
 0x555   :  { %v2958_v29 = vadd.f32 %v2954_v27, %v2885_v26  ;;  %v5413_v26 = vld [vmem:[%s8785_s11 + $0x88] sm:$0xff]  ;;  %v5400_v27 = vld [vmem:[%s8784_s10 + $0x98] sm:$0x3f] }
 0x556   :  { %v6541_v31 = vpop.f32.mrf.mxu0 }
 0x557   :  { %v2959_v32 = vmax.f32 %v2747_v28, %v2958_v29  ;;  %v4008_v28 = vld [vmem:[%s8785_s11 + $0x38] sm:$0xff]  ;;  %v5412_v29 = vld [vmem:[%s8785_s11 + $0x80] sm:$0xff] }
 0x558   :  { %v5411_v31 = vld [vmem:[%s8785_s11 + $0x78] sm:$0xff] }
 0x559   :  { %v2967_v33 = vadd.f32 %v5340_v30, %v2959_v32  ;;  %v4007_v30 = vld [vmem:[%s8785_s11 + $0x30] sm:$0xff]  ;;  %v4006_v32 = vld [vmem:[%s8785_s11 + $0x28] sm:$0xff] }
 0x55b   :  { %v2968_v34 = vmax.f32 %v2967_v33, 0.0  ;;  %v5410_v33 = vld [vmem:[%s8785_s11 + $0x70] sm:$0xff] }
 0x55d   :  { %6542 = vmatprep.subr.msk.mxu1 %vm329_vm1, %v2968_v34  ;;  %6547 = vmatprep.subr.msk.mxu0 %vm329_vm1, %v2968_v34 }
 0x55e   :  { %6543 = vmatpush3.msk.msra.mxu1 %vm329_vm1, %v2968_v34  ;;  %6548 = vmatpush3.msk.msra.mxu0 %vm329_vm1, %v2968_v34 }
 0x55f   :  { %6545 = vmatmul.mubr.msk.f32.vlgmr.msra.gmra.mxu1 %vm2971_vm7, %v2970_v35  ;;  %6550 = vmatmul.mubr.msk.f32.vlgmr.msra.gmra.mxu0 %vm2971_vm7, %v5345_v36  ;;  %v5409_v35 = vld [vmem:[%s8785_s11 + $0x68] sm:$0xff]  ;;  %v4004_v36 = vld [vmem:[%s8785_s11 + $0x18] sm:$0xff] }
 0x560   :  { %6552 = vmatprep.subr.msk.mxu1 %vm329_vm1, %v2968_v34  ;;  %6554 = vmatprep.mubr.msk.f32.mxu1 %vm2971_vm7, %v5349_v37  ;;  %v5408_v37 = vld [vmem:[%s8785_s11 + $0x60] sm:$0xff] }
 0x561   :  { %6553 = vmatpush3.msk.msra.mxu1 %vm329_vm1, %v2968_v34  ;;  %6557 = vmatprep.subr.mxu0 %v5355_v39  ;;  %v4005_v34 = vld [vmem:[%s8785_s11 + $0x20] sm:$0xff] }
 0x562   :  { %6564 = vmatprep.subr.mxu1 %v3225_v41  ;;  %6558 = vmatpush3.msra.mxu0 %v5355_v39  ;;  %v5407_v39 = vld [vmem:[%s8785_s11 + $0x58] sm:$0xff] }
 0x563   :  { %6555 = vmatmul.mubr.msk.f32.vlgmr.msra.gmra.mxu1 %vm2971_vm7, %v5350_v38  ;;  %6559 = vmatprep.subr.mxu0 %v5354_v43  ;;  %v4003_v38 = vld [vmem:[%s8785_s11 + $0x10] sm:$0xff] }
 0x564   :  { %6565 = vmatpush3.msra.mxu1 %v3225_v41  ;;  %6560 = vmatpush3.msra.mxu0 %v5354_v43  ;;  %v4002_v41 = vld [vmem:[%s8785_s11 + $0x8] sm:$0xff]  ;;  %v5406_v43 = vld [vmem:[%s8785_s11 + $0x50] sm:$0xff] }
 0x565   :  { %6566 = vmatprep.subr.mxu1 %v3224_v44  ;;  %6571 = vmatprep.subr.mxu0 %v5361_v45 }
 0x566   :  { %6567 = vmatpush3.msra.mxu1 %v3224_v44  ;;  %v4001_v44 = vld [vmem:[%s8785_s11] sm:$0xff] }
 0x61f   :  { %v6546_v5 = vpop.f32.mrf.mxu1  ;;  %v6551_v9 = vpop.f32.mrf.mxu0 }
 0x621   :  { %v3047_v10 = vpop.f32.mrf.mxu1  ;;  %v3131_v14 = vpop.f32.mrf.mxu0 }
 0x622   :  { %6561 = vmatprep.mubr.msk.f32.mxu0 %vm3229_vm8, %v3131_v14  ;;  %6568 = vmatprep.mubr.msk.f32.mxu1 %vm3229_vm8, %v3047_v10 }
 0x623   :  { %v6556_v3 = vpop.f32.mrf.mxu1  ;;  %6562 = vmatmul.mubr.msk.f32.vlgmr.msra.gmra.mxu0 %vm3229_vm8, %v6551_v9  ;;  %6569 = vmatmul.mubr.msk.f32.vlgmr.msra.gmra.mxu1 %vm3229_vm8, %v6546_v5  ;;  %v5447_v5 = vld [vmem:[%s8785_s11 + $0x138] sm:$0xff] }
 0x624   :  { %6572 = vmatpush3.msra.mxu0 %v5361_v45  ;;  %6582 = vmatprep.mubr.msk.f32.mxu1 %vm1576_vm5, %v3489_v42  ;;  %v5433_v45 = vld [vmem:[%s8785_s11 + $0xe8] sm:$0xff]  ;;  %v5431_v42 = vld [vmem:[%s8785_s11 + $0xd8] sm:$0xff] }
 0x625   :  { %v3215_v40 = vpop.f32.mrf.mxu1  ;;  %6573 = vmatprep.subr.mxu0 %v5360_v6 }
 0x626   :  { %6574 = vmatpush3.msra.mxu0 %v5360_v6  ;;  %6575 = vmatprep.mubr.msk.f32.mxu0 %vm3229_vm8, %v3215_v40  ;;  %v5446_v40 = vld [vmem:[%s8785_s11 + $0x130] sm:$0xff] }
 0x627   :  { %6576 = vmatmul.mubr.msk.f32.vlgmr.msra.gmra.mxu0 %vm3229_vm8, %v6556_v3  ;;  %v5432_v3 = vld [vmem:[%s8785_s11 + $0xe0] sm:$0xff] }
 0x628   :  { %6592 = vmatprep.mubr.msk.f32.mxu0 %vm1576_vm5, %v5370_v46  ;;  %v5445_v46 = vld [vmem:[%s8785_s11 + $0x128] sm:$0xff] }
 0x6e3   :  { %v6563_v47 = vpop.f32.mrf.mxu0  ;;  %v6570_v48 = vpop.f32.mrf.mxu1 }
 0x6e4   :  { %v3389_v51 = vadd.f32 %v6570_v48, %v6563_v47  ;;  %v5430_v48 = vld [vmem:[%s8785_s11 + $0xd0] sm:$0xff] }
 0x6e5   :  { %v3302_v49 = vpop.f32.mrf.mxu0  ;;  %v3383_v50 = vpop.f32.mrf.mxu1 }
 0x6e6   :  { %v3384_v54 = vadd.f32 %v3383_v50, %v3302_v49  ;;  %v5444_v49 = vld [vmem:[%s8785_s11 + $0x120] sm:$0xff] }
 0x6e7   :  { %v6577_v52 = vpop.f32.mrf.mxu0 }
 0x6e8   :  { %v3477_v55 = vadd.f32 %v6577_v52, %v3389_v51  ;;  %v5429_v51 = vld [vmem:[%s8785_s11 + $0xc8] sm:$0xff]  ;;  %v5443_v52 = vld [vmem:[%s8785_s11 + $0x118] sm:$0xff] }
 0x6e9   :  { %v3467_v56 = vpop.f32.mrf.mxu0 }
 0x6ea   :  { %v3486_v57 = vadd.f32 %v5364_v53, %v3477_v55  ;;  %v3476_v58 = vadd.f32 %v3467_v56, %v3384_v54  ;;  %v5428_v54 = vld [vmem:[%s8785_s11 + $0xc0] sm:$0xff]  ;;  %v5442_v55 = vld [vmem:[%s8785_s11 + $0x110] sm:$0xff] }
 0x6ec   :  { %v3488_v59 = vmax.f32 %v3486_v57, 0.0  ;;  %v3485_v60 = vadd.f32 %v5364_v53, %v3476_v58  ;;  %v5427_v58 = vld [vmem:[%s8785_s11 + $0xb8] sm:$0xff] }
 0x6ee   :  { %v3487_v61 = vmax.f32 %v3485_v60, 0.0  ;;  %6578 = vmatprep.subr.msk.mxu1 %vm1580_vm4, %v3488_v59  ;;  %6588 = vmatprep.subr.msk.mxu0 %vm1580_vm4, %v3488_v59  ;;  %v5426_v60 = vld [vmem:[%s8785_s11 + $0xb0] sm:$0xff] }
 0x6ef   :  { %6579 = vmatpush3.msk.msra.mxu1 %vm1580_vm4, %v3488_v59  ;;  %6589 = vmatpush3.msk.msra.mxu0 %vm1580_vm4, %v3488_v59 }
 0x6f0   :  { %6580 = vmatprep.subr.mxu1 %v3487_v61  ;;  %6590 = vmatprep.subr.mxu0 %v3487_v61 }
 0x6f1   :  { %6581 = vmatpush3.msra.mxu1 %v3487_v61  ;;  %6591 = vmatpush3.msra.mxu0 %v3487_v61 }
 0x6f2   :  { %6583 = vmatmul.mubr.msk.f32.vlgmr.msra.gmra.mxu1 %vm1576_vm5, %v3490_v62  ;;  %6593 = vmatmul.mubr.msk.f32.vlgmr.msra.gmra.mxu0 %vm1576_vm5, %v5371_v63  ;;  %v5425_v63 = vld [vmem:[%s8785_s11 + $0xa8] sm:$0xff] }
 0x6f3   :  { %6598 = vmatprep.subr.msk.mxu1 %vm1580_vm4, %v3488_v59  ;;  %6608 = vmatprep.subr.msk.mxu0 %vm1580_vm4, %v3488_v59 }
 0x6f4   :  { %6599 = vmatpush3.msk.msra.mxu1 %vm1580_vm4, %v3488_v59  ;;  %6609 = vmatpush3.msk.msra.mxu0 %vm1580_vm4, %v3488_v59 }
 0x6f5   :  { %6600 = vmatprep.subr.mxu1 %v3487_v61  ;;  %6610 = vmatprep.subr.mxu0 %v3487_v61 }
 0x6f6   :  { %6585 = vmatprep.mubr.msk.f32.mxu1 %vm1576_vm5, %v3491_v0  ;;  %6601 = vmatpush3.msra.mxu1 %v3487_v61  ;;  %v5440_v0 = vld [vmem:[%s8785_s11 + $0x100] sm:$0xff] }
 0x6f7   :  { %6611 = vmatpush3.msra.mxu0 %v3487_v61  ;;  %6586 = vmatmul.mubr.msk.f32.gmra.mxu1 %vm1576_vm5, %v3492_v1 }
 0x6f8   :  { %6618 = vmatprep.subr.msk.mxu1 %vm1580_vm4, %v3488_v59  ;;  %6602 = vmatprep.mubr.msk.f32.mxu1 %vm1576_vm5, %v5379_v2  ;;  %v5424_v2 = vld [vmem:[%s8785_s11 + $0xa0] sm:$0xff] }
 0x6f9   :  { %6595 = vmatprep.mubr.msk.f32.mxu0 %vm1576_vm5, %v5372_v4  ;;  %6628 = vmatprep.subr.mxu0 %v5415_v7  ;;  %v5439_v4 = vld [vmem:[%s8785_s11 + $0xf8] sm:$0xff] }
 0x6fa   :  { %6596 = vmatmul.mubr.msk.f32.gmra.mxu0 %vm1576_vm5, %v5373_v8  ;;  %v5438_v8 = vld [vmem:[%s8785_s11 + $0xf0] sm:$0xff] }
 0x6fb   :  { %6603 = vmatmul.mubr.msk.f32.vlgmr.msra.gmra.mxu1 %vm1576_vm5, %v5380_v11  ;;  %6612 = vmatprep.mubr.msk.f32.mxu0 %vm1576_vm5, %v5388_v12  ;;  %v5461_v11 = vld [vmem:[%s8785_s11 + $0x188] sm:$0xff] }
 0x6fc   :  { %6619 = vmatpush3.msk.msra.mxu1 %vm1580_vm4, %v3488_v59  ;;  %6605 = vmatprep.mubr.msk.f32.mxu1 %vm1576_vm5, %v5381_v15 }
 0x6fd   :  { %6620 = vmatprep.subr.mxu1 %v3487_v61 }
 0x6fe   :  { %6621 = vmatpush3.msra.mxu1 %v3487_v61  ;;  %6613 = vmatmul.mubr.msk.f32.vlgmr.msra.gmra.mxu0 %vm1576_vm5, %v5389_v16  ;;  %v5441_v61 = vld [vmem:[%s8785_s11 + $0x108] sm:$0xff]  ;;  %v5460_v16 = vld [vmem:[%s8785_s11 + $0x180] sm:$0xff] }
 0x6ff   :  { %6606 = vmatmul.mubr.msk.f32.gmra.mxu1 %vm1576_vm5, %v5382_v17  ;;  %6615 = vmatprep.mubr.msk.f32.mxu0 %vm1576_vm5, %v5390_v18 }
 0x700   :  { %6622 = vmatprep.mubr.msk.f32.mxu1 %vm1576_vm5, %v5397_v19  ;;  %6629 = vmatpush3.msra.mxu0 %v5415_v7  ;;  %v5459_v19 = vld [vmem:[%s8785_s11 + $0x178] sm:$0xff] }
 0x701   :  { %6654 = vmatprep.subr.mxu1 %v4010_v20  ;;  %6630 = vmatprep.subr.mxu0 %v5414_v21 }
 0x702   :  { %6616 = vmatmul.mubr.msk.f32.gmra.mxu0 %vm1576_vm5, %v5391_v22  ;;  %v5457_v22 = vld [vmem:[%s8785_s11 + $0x168] sm:$0xff] }
 0x703   :  { %6623 = vmatmul.mubr.msk.f32.vlgmr.msra.gmra.mxu1 %vm1576_vm5, %v5398_v23  ;;  %6631 = vmatpush3.msra.mxu0 %v5414_v21  ;;  %v5456_v23 = vld [vmem:[%s8785_s11 + $0x160] sm:$0xff] }
 0x704   :  { %6625 = vmatprep.mubr.msk.f32.mxu1 %vm1576_vm5, %v5399_v24  ;;  %6655 = vmatpush3.msra.mxu1 %v4010_v20  ;;  %v5458_v20 = vld [vmem:[%s8785_s11 + $0x170] sm:$0xff]  ;;  %v5455_v24 = vld [vmem:[%s8785_s11 + $0x158] sm:$0xff] }
 0x705   :  { %6656 = vmatprep.subr.mxu1 %v4009_v25  ;;  %6632 = vmatprep.subr.mxu0 %v5413_v26 }
 0x706   :  { %6657 = vmatpush3.msra.mxu1 %v4009_v25  ;;  %6633 = vmatpush3.msra.mxu0 %v5413_v26  ;;  %v5454_v25 = vld [vmem:[%s8785_s11 + $0x150] sm:$0xff]  ;;  %v5453_v26 = vld [vmem:[%s8785_s11 + $0x148] sm:$0xff] }
 0x707   :  { %6626 = vmatmul.mubr.msk.f32.gmra.mxu1 %vm1576_vm5, %v5400_v27  ;;  %6658 = vmatprep.subr.mxu1 %v4008_v28 }
 0x708   :  { %6634 = vmatprep.subr.mxu0 %v5412_v29  ;;  %6659 = vmatpush3.msra.mxu1 %v4008_v28  ;;  %v5452_v28 = vld [vmem:[%s8785_s11 + $0x140] sm:$0xff] }
 0x709   :  { %6635 = vmatpush3.msra.mxu0 %v5412_v29  ;;  %6660 = vmatprep.subr.mxu1 %v4007_v30 }
 0x70a   :  { %6636 = vmatprep.subr.mxu0 %v5411_v31  ;;  %6661 = vmatpush3.msra.mxu1 %v4007_v30 }
 0x70b   :  { %6637 = vmatpush3.msra.mxu0 %v5411_v31  ;;  %6662 = vmatprep.subr.mxu1 %v4006_v32 }
 0x70c   :  { %6638 = vmatprep.subr.mxu0 %v5410_v33  ;;  %6663 = vmatpush3.msra.mxu1 %v4006_v32 }
 0x70d   :  { %6639 = vmatpush3.msra.mxu0 %v5410_v33  ;;  %6664 = vmatprep.subr.mxu1 %v4005_v34 }
 0x70e   :  { %6640 = vmatprep.subr.mxu0 %v5409_v35  ;;  %6665 = vmatpush3.msra.mxu1 %v4005_v34 }
 0x70f   :  { %6641 = vmatpush3.msra.mxu0 %v5409_v35  ;;  %6666 = vmatprep.subr.mxu1 %v4004_v36 }
 0x710   :  { %6642 = vmatprep.subr.mxu0 %v5408_v37  ;;  %6667 = vmatpush3.msra.mxu1 %v4004_v36 }
 0x711   :  { %6643 = vmatpush3.msra.mxu0 %v5408_v37  ;;  %6668 = vmatprep.subr.mxu1 %v4003_v38 }
 0x712   :  { %6644 = vmatprep.subr.mxu0 %v5407_v39  ;;  %6669 = vmatpush3.msra.mxu1 %v4003_v38 }
 0x713   :  { %6645 = vmatpush3.msra.mxu0 %v5407_v39  ;;  %6670 = vmatprep.subr.mxu1 %v4002_v41 }
 0x714   :  { %6646 = vmatprep.subr.mxu0 %v5406_v43  ;;  %6671 = vmatpush3.msra.mxu1 %v4002_v41 }
 0x715   :  { %6647 = vmatpush3.msra.mxu0 %v5406_v43  ;;  %6672 = vmatprep.subr.mxu1 %v4001_v44 }
 0x716   :  { %6673 = vmatpush3.msra.mxu1 %v4001_v44  ;;  %6680 = vmatprep.subr.mxu0 %v5433_v45 }
 0x717   :  { %6706 = vmatprep.subr.mxu1 %v5447_v5 }
 0x7b2   :  { %v6584_v9 = vpop.f32.mrf.mxu1  ;;  %v6594_v10 = vpop.f32.mrf.mxu0 }
 0x7b4   :  { %v3574_v14 = vpop.f32.mrf.mxu1  ;;  %v3676_v6 = vpop.f32.mrf.mxu0 }
 0x7b5   :  { %6648 = vmatprep.mubr.msk.f32.mxu0 %vm1825_vm6, %v3676_v6  ;;  %6674 = vmatprep.mubr.msk.f32.mxu1 %vm1825_vm6, %v3574_v14 }
 0x7b6   :  { %6649 = vmatmul.mubr.msk.f32.vlgmr.msra.gmra.mxu0 %vm1825_vm6, %v6594_v10  ;;  %6675 = vmatmul.mubr.msk.f32.vlgmr.msra.gmra.mxu1 %vm1825_vm6, %v6584_v9 }
 0x7b7   :  { %6681 = vmatpush3.msra.mxu0 %v5433_v45  ;;  %6707 = vmatpush3.msra.mxu1 %v5447_v5  ;;  %v6587_v47 = vpop.f32.mrf.mxu1 }
 0x7b8   :  { %6682 = vmatprep.subr.mxu0 %v5432_v3  ;;  %6708 = vmatprep.subr.mxu1 %v5446_v40 }
 0x7b9   :  { %6683 = vmatpush3.msra.mxu0 %v5432_v3  ;;  %6709 = vmatpush3.msra.mxu1 %v5446_v40  ;;  %v3584_v53 = vpop.f32.mrf.mxu1 }
 0x7ba   :  { %6684 = vmatprep.subr.mxu0 %v5431_v42  ;;  %6710 = vmatprep.subr.mxu1 %v5445_v46  ;;  %v6597_v50 = vpop.f32.mrf.mxu0 }
 0x7bb   :  { %6685 = vmatpush3.msra.mxu0 %v5431_v42  ;;  %6711 = vmatpush3.msra.mxu1 %v5445_v46  ;;  %v6604_v57 = vpop.f32.mrf.mxu1 }
 0x7bc   :  { %6686 = vmatprep.subr.mxu0 %v5430_v48  ;;  %6712 = vmatprep.subr.mxu1 %v5444_v49  ;;  %v3686_v56 = vpop.f32.mrf.mxu0 }
 0x7bd   :  { %6687 = vmatpush3.msra.mxu0 %v5430_v48  ;;  %6713 = vmatpush3.msra.mxu1 %v5444_v49  ;;  %v3778_v62 = vpop.f32.mrf.mxu1 }
 0x7be   :  { %6688 = vmatprep.subr.mxu0 %v5429_v51  ;;  %6714 = vmatprep.subr.mxu1 %v5443_v52  ;;  %v6614_v59 = vpop.f32.mrf.mxu0 }
 0x7bf   :  { %6689 = vmatpush3.msra.mxu0 %v5429_v51  ;;  %6715 = vmatpush3.msra.mxu1 %v5443_v52  ;;  %v6607_v7 = vpop.f32.mrf.mxu1 }
 0x7c0   :  { %6690 = vmatprep.subr.mxu0 %v5428_v54  ;;  %6716 = vmatprep.subr.mxu1 %v5442_v55  ;;  %v3880_v1 = vpop.f32.mrf.mxu0 }
 0x7c1   :  { %6691 = vmatpush3.msra.mxu0 %v5428_v54  ;;  %6651 = vmatprep.mubr.msk.f32.mxu0 %vm1825_vm6, %v3686_v56  ;;  %v3788_v15 = vpop.f32.mrf.mxu1 }
 0x7c2   :  { %6692 = vmatprep.subr.mxu0 %v5427_v58  ;;  %6677 = vmatprep.mubr.msk.f32.mxu1 %vm1825_vm6, %v3584_v53  ;;  %v6617_v12 = vpop.f32.mrf.mxu0 }
 0x7c3   :  { %6693 = vmatpush3.msra.mxu0 %v5427_v58  ;;  %6717 = vmatpush3.msra.mxu1 %v5442_v55  ;;  %v6624_v17 = vpop.f32.mrf.mxu1 }
 0x7c4   :  { %6652 = vmatmul.mubr.msk.f32.gmra.mxu0 %vm1825_vm6, %v6597_v50  ;;  %6678 = vmatmul.mubr.msk.f32.gmra.mxu1 %vm1825_vm6, %v6587_v47  ;;  %v3890_v18 = vpop.f32.mrf.mxu0 }
 0x7c5   :  { %6694 = vmatprep.subr.mxu0 %v5426_v60  ;;  %6718 = vmatprep.subr.mxu1 %v5441_v61  ;;  %v3982_v21 = vpop.f32.mrf.mxu1 }
 0x7c6   :  { %6695 = vmatpush3.msra.mxu0 %v5426_v60  ;;  %6719 = vmatpush3.msra.mxu1 %v5441_v61 }
 0x7c7   :  { %6696 = vmatprep.subr.mxu0 %v5425_v63  ;;  %6720 = vmatprep.subr.mxu1 %v5440_v0  ;;  %v6627_v27 = vpop.f32.mrf.mxu1 }
 0x7c8   :  { %6697 = vmatpush3.msra.mxu0 %v5425_v63  ;;  %6721 = vmatpush3.msra.mxu1 %v5440_v0 }
 0x7c9   :  { %6698 = vmatprep.subr.mxu0 %v5424_v2  ;;  %6722 = vmatprep.subr.mxu1 %v5439_v4  ;;  %v3992_v29 = vpop.f32.mrf.mxu1 }
 0x7ca   :  { %6699 = vmatpush3.msra.mxu0 %v5424_v2  ;;  %6700 = vmatprep.mubr.msk.f32.mxu0 %vm1825_vm6, %v3778_v62 }
 0x7cb   :  { %6723 = vmatpush3.msra.mxu1 %v5439_v4  ;;  %6701 = vmatmul.mubr.msk.f32.vlgmr.msra.gmra.mxu0 %vm1825_vm6, %v6604_v57  ;;  %v5466_v57 = vld [vmem:[%s8786_s12] ss:$0 sm:$0xff] }
 0x7cc   :  { %6724 = vmatprep.subr.mxu1 %v5438_v8  ;;  %6732 = vmatprep.subr.mxu0 %v5461_v11 }
 0x7cd   :  { %6725 = vmatpush3.msra.mxu1 %v5438_v8  ;;  %6726 = vmatprep.mubr.msk.f32.mxu1 %vm1825_vm6, %v3880_v1  ;;  %v4567_v8 = vld [vmem:[%s8787_s13] sm:$0xff] }
 0x7ce   :  { %6733 = vmatpush3.msra.mxu0 %v5461_v11  ;;  %6727 = vmatmul.mubr.msk.f32.vlgmr.msra.gmra.mxu1 %vm1825_vm6, %v6614_v59  ;;  %v5475_v11 = vld [vmem:[%s8787_s13 + $0x38] sm:$0xff] }
 0x7cf   :  { %6734 = vmatprep.subr.mxu0 %v5460_v16  ;;  %6703 = vmatprep.mubr.msk.f32.mxu0 %vm1825_vm6, %v3788_v15  ;;  %v4843_v15 = vld [vmem:[%s8788_s14 + $0x70] sm:$0xff] }
 0x7d0   :  { %6735 = vmatpush3.msra.mxu0 %v5460_v16  ;;  %6729 = vmatprep.mubr.msk.f32.mxu1 %vm1825_vm6, %v3890_v18  ;;  %v4568_v16 = vld [vmem:[%s8787_s13 + $0x8] sm:$0xff]  ;;  %v5503_v18 = vld [vmem:[%s8788_s14 + $0xe0] sm:$0xff] }
 0x7d1   :  { %6704 = vmatmul.mubr.msk.f32.gmra.mxu0 %vm1825_vm6, %v6607_v7  ;;  %6736 = vmatprep.subr.mxu0 %v5459_v19 }
 0x7d2   :  { %6737 = vmatpush3.msra.mxu0 %v5459_v19  ;;  %6730 = vmatmul.mubr.msk.f32.gmra.mxu1 %vm1825_vm6, %v6617_v12  ;;  %v5504_v12 = vld [vmem:[%s8788_s14 + $0xe8] sm:$0xff] }
 0x7d3   :  { %6738 = vmatprep.subr.mxu0 %v5458_v20  ;;  %6752 = vmatprep.mubr.msk.f32.mxu0 %vm1825_vm6, %v3982_v21  ;;  %v4842_v19 = vld [vmem:[%s8788_s14 + $0x68] sm:$0xff] }
 0x7d4   :  { %6739 = vmatpush3.msra.mxu0 %v5458_v20  ;;  %6758 = vmatprep.subr.mxu1 %v6973_v13  ;;  %v4569_v20 = vld [vmem:[%s8787_s13 + $0x10] sm:$0xff]  ;;  %v5477_v21 = vld [vmem:[%s8787_s13 + $0x48] sm:$0xff] }
 0x7d5   :  { %6740 = vmatprep.subr.mxu0 %v5457_v22  ;;  %6766 = vmatprep.mubr.msk.f32.mxu1 %vm6974_vm3, %v6973_v13 }
 0x7d6   :  { %6741 = vmatpush3.msra.mxu0 %v5457_v22  ;;  %v5502_v22 = vld [vmem:[%s8788_s14 + $0xd8] sm:$0xff] }
 0x7d7   :  { %6742 = vmatprep.subr.mxu0 %v5456_v23 }
 0x7d8   :  { %6743 = vmatpush3.msra.mxu0 %v5456_v23  ;;  %v4841_v23 = vld [vmem:[%s8788_s14 + $0x60] sm:$0xff] }
 0x7d9   :  { %6744 = vmatprep.subr.mxu0 %v5455_v24 }
 0x7da   :  { %6745 = vmatpush3.msra.mxu0 %v5455_v24  ;;  %v4570_v24 = vld [vmem:[%s8787_s13 + $0x18] sm:$0xff] }
 0x7db   :  { %6746 = vmatprep.subr.mxu0 %v5454_v25 }
 0x7dc   :  { %6747 = vmatpush3.msra.mxu0 %v5454_v25  ;;  %v5478_v25 = vld [vmem:[%s8787_s13 + $0x50] sm:$0xff] }
 0x7dd   :  { %6748 = vmatprep.subr.mxu0 %v5453_v26 }
 0x7de   :  { %6749 = vmatpush3.msra.mxu0 %v5453_v26  ;;  %v5501_v26 = vld [vmem:[%s8788_s14 + $0xd0] sm:$0xff] }
 0x7df   :  { %6750 = vmatprep.subr.mxu0 %v5452_v28 }
 0x7e0   :  { %6751 = vmatpush3.msra.mxu0 %v5452_v28  ;;  %v4571_v28 = vld [vmem:[%s8787_s13 + $0x20] sm:$0xff] }
 0x7e1   :  { %6753 = vmatmul.mubr.msk.f32.vlgmr.msra.gmra.mxu0 %vm1825_vm6, %v6624_v17  ;;  %6787 = vmatprep.subr.mxu0 %v6973_v13  ;;  %v5476_v17 = vld [vmem:[%s8787_s13 + $0x40] sm:$0xff] }
 0x7e2   :  { %6755 = vmatprep.mubr.msk.f32.mxu0 %vm1825_vm6, %v3992_v29  ;;  %v5479_v29 = vld [vmem:[%s8787_s13 + $0x58] sm:$0xff] }
 0x7e5   :  { %6756 = vmatmul.mubr.msk.f32.gmra.mxu0 %vm1825_vm6, %v6627_v27  ;;  %v4840_v27 = vld [vmem:[%s8788_s14 + $0x58] sm:$0xff] }
 0x7e6   :  { %6795 = vmatprep.mubr.msk.f32.mxu0 %vm6974_vm3, %v6973_v13 }
 0x876   :  { %v6650_v30 = vpop.f32.mrf.mxu0  ;;  %v6676_v31 = vpop.f32.mrf.mxu1 }
 0x877   :  { %v4203_v45 = vadd.f32 %v6676_v31, %v6650_v30  ;;  %v5500_v30 = vld [vmem:[%s8788_s14 + $0xc8] sm:$0xff]  ;;  %v4839_v31 = vld [vmem:[%s8788_s14 + $0x50] sm:$0xff] }
 0x878   :  { %v4100_v32 = vpop.f32.mrf.mxu0  ;;  %v4197_v34 = vpop.f32.mrf.mxu1 }
 0x879   :  { %v4198_v14 = vadd.f32 %v4197_v34, %v4100_v32  ;;  %v4572_v32 = vld [vmem:[%s8787_s13 + $0x28] sm:$0xff]  ;;  %v5499_v34 = vld [vmem:[%s8788_s14 + $0xc0] sm:$0xff] }
 0x884   :  { %v6653_v33 = vpop.f32.mrf.mxu0  ;;  %v6679_v35 = vpop.f32.mrf.mxu1 }
 0x885   :  { %v4213_v5 = vadd.f32 %v6679_v35, %v6653_v33  ;;  %v5480_v33 = vld [vmem:[%s8787_s13 + $0x60] sm:$0xff]  ;;  %v4838_v35 = vld [vmem:[%s8788_s14 + $0x48] sm:$0xff] }
 0x886   :  { %v4110_v36 = vpop.f32.mrf.mxu0  ;;  %v4207_v38 = vpop.f32.mrf.mxu1 }
 0x887   :  { %v4208_v6 = vadd.f32 %v4207_v38, %v4110_v36  ;;  %v4573_v36 = vld [vmem:[%s8787_s13 + $0x30] sm:$0xff]  ;;  %v5498_v38 = vld [vmem:[%s8788_s14 + $0xb8] sm:$0xff] }
 0x88b   :  { %v6702_v37 = vpop.f32.mrf.mxu0 }
 0x88c   :  { %v4325_v3 = vadd.f32 %v6702_v37, %v4203_v45  ;;  %v5481_v37 = vld [vmem:[%s8787_s13 + $0x68] sm:$0xff]  ;;  %v4835_v45 = vld [vmem:[%s8788_s14 + $0x30] sm:$0xff] }
 0x88d   :  { %v4305_v39 = vpop.f32.mrf.mxu0 }
 0x88e   :  { %v6728_v41 = vpop.f32.mrf.mxu1  ;;  %v4324_v46 = vadd.f32 %v4305_v39, %v4198_v14  ;;  %v4837_v39 = vld [vmem:[%s8788_s14 + $0x40] sm:$0xff] }
 0x88f   :  { %v4437_v50 = vadd.f32 %v6728_v41, %v4325_v3  ;;  %v5497_v41 = vld [vmem:[%s8788_s14 + $0xb0] sm:$0xff]  ;;  %v4833_v14 = vld [vmem:[%s8788_s14 + $0x20] sm:$0xff]  ;;  %v4832_v3 = vld [vmem:[%s8788_s14 + $0x18] sm:$0xff] }
 0x890   :  { %v4417_v44 = vpop.f32.mrf.mxu1 }
 0x891   :  { %v6705_v43 = vpop.f32.mrf.mxu0  ;;  %v4436_v53 = vadd.f32 %v4417_v44, %v4324_v46  ;;  %v5496_v44 = vld [vmem:[%s8788_s14 + $0xa8] sm:$0xff]  ;;  %v5491_v46 = vld [vmem:[%s8788_s14 + $0x80] sm:$0xff] }
 0x892   :  { %v6731_v10 = vpop.f32.mrf.mxu1  ;;  %v4327_v40 = vadd.f32 %v6705_v43, %v4213_v5  ;;  %v4836_v43 = vld [vmem:[%s8788_s14 + $0x38] sm:$0xff]  ;;  %v5495_v5 = vld [vmem:[%s8788_s14 + $0xa0] sm:$0xff] }
 0x893   :  { %v4315_v9 = vpop.f32.mrf.mxu0 }
 0x894   :  { %v4326_v47 = vadd.f32 %v4315_v9, %v4208_v6  ;;  %v4427_v48 = vpop.f32.mrf.mxu1  ;;  %v4439_v51 = vadd.f32 %v6731_v10, %v4327_v40  ;;  %v4834_v9 = vld [vmem:[%s8788_s14 + $0x28] sm:$0xff]  ;;  %v5494_v10 = vld [vmem:[%s8788_s14 + $0x98] sm:$0xff]  ;;  %v5493_v6 = vld [vmem:[%s8788_s14 + $0x90] sm:$0xff] }
 0x895   :  { %v5492_v40 = vld [vmem:[%s8788_s14 + $0x88] sm:$0xff] }
 0x896   :  { %v4438_v54 = vadd.f32 %v4427_v48, %v4326_v47  ;;  %v4830_v47 = vld [vmem:[%s8788_s14 + $0x8] sm:$0xff]  ;;  %v5490_v48 = vld [vmem:[%s8788_s14 + $0x78] sm:$0xff] }
 0x8a1   :  { %v6754_v42 = vpop.f32.mrf.mxu0 }
 0x8a2   :  { %v4549_v55 = vadd.f32 %v6754_v42, %v4437_v50  ;;  %v4831_v42 = vld [vmem:[%s8788_s14 + $0x10] sm:$0xff] }
 0x8a3   :  { %v4529_v49 = vpop.f32.mrf.mxu0 }
 0x8a4   :  { %v4548_v59 = vadd.f32 %v4529_v49, %v4436_v53  ;;  %v4560_v62 = vadd.f32 %v5466_v57, %v4549_v55  ;;  %v4829_v49 = vld [vmem:[%s8788_s14] sm:$0xff] }
 0x8a5   :  { %v6757_v52 = vpop.f32.mrf.mxu0 }
 0x8a6   :  { %v4551_v56 = vadd.f32 %v6757_v52, %v4439_v51  ;;  %v4559_v1 = vadd.f32 %v5466_v57, %v4548_v59  ;;  %v4564_v4 = vmax.f32 %v4560_v62, 0.0 }
 0x8a7   :  { %v4539_v58 = vpop.f32.mrf.mxu0 }
 0x8a8   :  { %v4562_v60 = vadd.f32 %v5466_v57, %v4551_v56  ;;  %v4550_v61 = vadd.f32 %v4539_v58, %v4438_v54  ;;  %v4563_v7 = vmax.f32 %v4559_v1, 0.0 }
 0x8aa   :  { %v4566_v63 = vmax.f32 %v4562_v60, 0.0  ;;  %v4561_v0 = vadd.f32 %v5466_v57, %v4550_v61 }
 0x8ac   :  { %v4565_v2 = vmax.f32 %v4561_v0, 0.0  ;;  %6759 = vmatpush3.msk.msra.mxu1 %vm4596_vm9, %v4566_v63  ;;  %6788 = vmatpush3.msk.msra.mxu0 %vm4596_vm9, %v4566_v63 }
 0x8ad   :  { %6760 = vmatprep.subr.mxu1 %v6973_v13  ;;  %6789 = vmatprep.subr.mxu0 %v6973_v13 }
 0x8ae   :  { %6761 = vmatpush3.msra.mxu1 %v4565_v2  ;;  %6790 = vmatpush3.msra.mxu0 %v4565_v2 }
 0x8af   :  { %6762 = vmatprep.subr.mxu1 %v6973_v13  ;;  %6791 = vmatprep.subr.mxu0 %v6973_v13 }
 0x8b0   :  { %6763 = vmatpush3.msra.mxu1 %v4564_v4  ;;  %6792 = vmatpush3.msra.mxu0 %v4564_v4 }
 0x8b1   :  { %6764 = vmatprep.subr.mxu1 %v6973_v13  ;;  %6793 = vmatprep.subr.mxu0 %v6973_v13 }
 0x8b2   :  { %6765 = vmatpush3.msra.mxu1 %v4563_v7  ;;  %6794 = vmatpush3.msra.mxu0 %v4563_v7 }
 0x8b3   :  { %6767 = vmatmul.mubr.msk.f32.vlgmr.msra.gmra.mxu1 %vm4574_vm10, %v4567_v8  ;;  %6796 = vmatmul.mubr.msk.f32.vlgmr.msra.gmra.mxu0 %vm4574_vm10, %v5475_v11 }
 0x8b4   :  { %6769 = vmatprep.mubr.msk.f32.mxu1 %vm6974_vm3, %v6973_v13  ;;  %6798 = vmatprep.mubr.msk.f32.mxu0 %vm6974_vm3, %v6973_v13 }
 0x8b5   :  { %6816 = vmatprep.subr.mxu1 %v6973_v13  ;;  %6867 = vmatprep.subr.mxu0 %v6973_v13 }
 0x8b6   :  { %6817 = vmatpush3.msra.mxu1 %v5504_v12  ;;  %6868 = vmatpush3.msra.mxu0 %v4843_v15 }
 0x8b7   :  { %6770 = vmatmul.mubr.msk.f32.gmra.mxu1 %vm4574_vm10, %v4568_v16  ;;  %6799 = vmatmul.mubr.msk.f32.gmra.mxu0 %vm4574_vm10, %v5476_v17 }
 0x8b8   :  { %6772 = vmatprep.mubr.msk.f32.mxu1 %vm6974_vm3, %v6973_v13  ;;  %6801 = vmatprep.mubr.msk.f32.mxu0 %vm6974_vm3, %v6973_v13 }
 0x8b9   :  { %6818 = vmatprep.subr.mxu1 %v6973_v13  ;;  %6869 = vmatprep.subr.mxu0 %v6973_v13 }
 0x8ba   :  { %6819 = vmatpush3.msra.mxu1 %v5503_v18  ;;  %6870 = vmatpush3.msra.mxu0 %v4842_v19 }
 0x8bb   :  { %6773 = vmatmul.mubr.msk.f32.gmra.mxu1 %vm4574_vm10, %v4569_v20  ;;  %6802 = vmatmul.mubr.msk.f32.gmra.mxu0 %vm4574_vm10, %v5477_v21 }
 0x8bc   :  { %6775 = vmatprep.mubr.msk.f32.mxu1 %vm6974_vm3, %v6973_v13  ;;  %6804 = vmatprep.mubr.msk.f32.mxu0 %vm6974_vm3, %v6973_v13 }
 0x8bd   :  { %6820 = vmatprep.subr.mxu1 %v6973_v13  ;;  %6871 = vmatprep.subr.mxu0 %v6973_v13 }
 0x8be   :  { %6821 = vmatpush3.msra.mxu1 %v5502_v22  ;;  %6872 = vmatpush3.msra.mxu0 %v4841_v23  ;;  %v5519_v23 = vld [vmem:[%s8789_s15] ss:$0 sm:$0xff]  ;;  %s6975_s15 = smov [#allocation2]  }
 0x8bf   :  { %6776 = vmatmul.mubr.msk.f32.gmra.mxu1 %vm4574_vm10, %v4570_v24  ;;  %6805 = vmatmul.mubr.msk.f32.gmra.mxu0 %vm4574_vm10, %v5478_v25  ;;  %s5171_s2 = sshll.u32 %s6975_s15, 4  ;;  %s5172_s2 = int_to_ptr.vmem [resolvable:$true] %s5171_s2 }
 0x8c0   :  { %6778 = vmatprep.mubr.msk.f32.mxu1 %vm6974_vm3, %v6973_v13  ;;  %6807 = vmatprep.mubr.msk.f32.mxu0 %vm6974_vm3, %v6973_v13  ;;  %s6951_s23 = scalar_lea.vmem %s5172_s2, 896  ;;  %p6956_p1 = scmp.lt.s32.totalorder %s5172_s2, %s5172_s2 }
 0x8c1   :  { %6822 = vmatprep.subr.mxu1 %v6973_v13  ;;  %6873 = vmatprep.subr.mxu0 %v6973_v13  ;;  %p6952_p0 = scmp.ne.s32.totalorder %s5172_s2, %s6951_s23  ;;  %p6957_p2 = scmp.lt.s32.totalorder %s6951_s23, %s6951_s23 }
 0x8c2   :  { %6823 = vmatpush3.msra.mxu1 %v5501_v26  ;;  %6874 = vmatpush3.msra.mxu0 %v4840_v27 }
 0x8c3   :  { %6779 = vmatmul.mubr.msk.f32.gmra.mxu1 %vm4574_vm10, %v4571_v28  ;;  %6808 = vmatmul.mubr.msk.f32.gmra.mxu0 %vm4574_vm10, %v5479_v29  ;;  %p6958_p3 = por %p6957_p2, %p6956_p1 }
 0x8c4   :  { %6781 = vmatprep.mubr.msk.f32.mxu1 %vm6974_vm3, %v6973_v13  ;;  %6810 = vmatprep.mubr.msk.f32.mxu0 %vm6974_vm3, %v6973_v13 }
 0x8c5   :  { %6824 = vmatprep.subr.mxu1 %v6973_v13  ;;  %6875 = vmatprep.subr.mxu0 %v6973_v13  ;;  %p6959_p4 = pnand %p6958_p3, %p6952_p0 }
 0x8c6   :  { %6825 = vmatpush3.msra.mxu1 %v5500_v30  ;;  %6876 = vmatpush3.msra.mxu0 %v4839_v31 }
 0x8c7   :  { %6782 = vmatmul.mubr.msk.f32.gmra.mxu1 %vm4574_vm10, %v4572_v32  ;;  %6811 = vmatmul.mubr.msk.f32.gmra.mxu0 %vm4574_vm10, %v5480_v33 }
 0x8c8   :  { %6784 = vmatprep.mubr.msk.f32.mxu1 %vm6974_vm3, %v6973_v13  ;;  %6813 = vmatprep.mubr.msk.f32.mxu0 %vm6974_vm3, %v6973_v13 }
 0x8c9   :  { %6826 = vmatprep.subr.mxu1 %v6973_v13  ;;  %6877 = vmatprep.subr.mxu0 %v6973_v13 }
 0x8ca   :  { %6827 = vmatpush3.msra.mxu1 %v5499_v34  ;;  %6878 = vmatpush3.msra.mxu0 %v4838_v35 }
 0x8cb   :  { %6785 = vmatmul.mubr.msk.f32.gmra.mxu1 %vm4574_vm10, %v4573_v36  ;;  %6814 = vmatmul.mubr.msk.f32.gmra.mxu0 %vm4574_vm10, %v5481_v37 }
 0x8cc   :  { %6828 = vmatprep.subr.mxu1 %v6973_v13  ;;  %6879 = vmatprep.subr.mxu0 %v6973_v13 }
 0x8cd   :  { %6829 = vmatpush3.msra.mxu1 %v5498_v38  ;;  %6880 = vmatpush3.msra.mxu0 %v4837_v39 }
 0x8ce   :  { %6830 = vmatprep.subr.mxu1 %v6973_v13  ;;  %6881 = vmatprep.subr.mxu0 %v6973_v13 }
 0x8cf   :  { %6831 = vmatpush3.msra.mxu1 %v5497_v41  ;;  %6882 = vmatpush3.msra.mxu0 %v4836_v43 }
 0x8d0   :  { %6832 = vmatprep.subr.mxu1 %v6973_v13  ;;  %6883 = vmatprep.subr.mxu0 %v6973_v13 }
 0x8d1   :  { %6833 = vmatpush3.msra.mxu1 %v5496_v44  ;;  %6884 = vmatpush3.msra.mxu0 %v4835_v45 }
 0x8d2   :  { %6834 = vmatprep.subr.mxu1 %v6973_v13  ;;  %6885 = vmatprep.subr.mxu0 %v6973_v13 }
 0x8d3   :  { %6835 = vmatpush3.msra.mxu1 %v5495_v5  ;;  %6886 = vmatpush3.msra.mxu0 %v4834_v9 }
 0x8d4   :  { %6836 = vmatprep.subr.mxu1 %v6973_v13  ;;  %6887 = vmatprep.subr.mxu0 %v6973_v13 }
 0x8d5   :  { %6837 = vmatpush3.msra.mxu1 %v5494_v10  ;;  %6888 = vmatpush3.msra.mxu0 %v4833_v14 }
 0x8d6   :  { %6838 = vmatprep.subr.mxu1 %v6973_v13  ;;  %6889 = vmatprep.subr.mxu0 %v6973_v13 }
 0x8d7   :  { %6839 = vmatpush3.msra.mxu1 %v5493_v6  ;;  %6890 = vmatpush3.msra.mxu0 %v4832_v3 }
 0x8d8   :  { %6840 = vmatprep.subr.mxu1 %v6973_v13  ;;  %6891 = vmatprep.subr.mxu0 %v6973_v13 }
 0x8d9   :  { %6841 = vmatpush3.msra.mxu1 %v5492_v40  ;;  %6892 = vmatpush3.msra.mxu0 %v4831_v42 }
 0x8da   :  { %6842 = vmatprep.subr.mxu1 %v6973_v13  ;;  %6893 = vmatprep.subr.mxu0 %v6973_v13 }
 0x8db   :  { %6843 = vmatpush3.msra.mxu1 %v5491_v46  ;;  %6894 = vmatpush3.msra.mxu0 %v4830_v47 }
 0x8dc   :  { %6844 = vmatprep.subr.mxu1 %v6973_v13  ;;  %6895 = vmatprep.subr.mxu0 %v6973_v13 }
 0x8dd   :  { %6846 = vmatprep.mubr.msk.f32.mxu1 %vm6974_vm3, %v6973_v13  ;;  %6897 = vmatprep.mubr.msk.f32.mxu0 %vm6974_vm3, %v6973_v13 }
 0x8de   :  { %6845 = vmatpush3.msra.mxu1 %v5490_v48  ;;  %6896 = vmatpush3.msra.mxu0 %v4829_v49 }
 0x973   :  { %v4666_v50 = vpop.f32.mrf.mxu1  ;;  %v4795_v51 = vpop.f32.mrf.mxu0 }
 0x974   :  { %6847 = vmatmul.mubr.msk.f32.vlgmr.msra.gmra.mxu1 %vm4860_vm11, %v4795_v51  ;;  %6898 = vmatmul.mubr.msk.f32.vlgmr.msra.gmra.mxu0 %vm4860_vm11, %v4666_v50 }
 0x975   :  { %v6768_v52 = vpop.f32.mrf.mxu1  ;;  %v6797_v53 = vpop.f32.mrf.mxu0  ;;  %6849 = vmatprep.mubr.msk.f32.mxu1 %vm6974_vm3, %v6973_v13  ;;  %6900 = vmatprep.mubr.msk.f32.mxu0 %vm6974_vm3, %v6973_v13 }
 0x977   :  { %v4671_v54 = vpop.f32.mrf.mxu1  ;;  %v4800_v55 = vpop.f32.mrf.mxu0 }
 0x978   :  { %6850 = vmatmul.mubr.msk.f32.gmra.mxu1 %vm4860_vm11, %v4800_v55  ;;  %6901 = vmatmul.mubr.msk.f32.gmra.mxu0 %vm4860_vm11, %v4671_v54 }
 0x979   :  { %v6771_v56 = vpop.f32.mrf.mxu1  ;;  %v6800_v57 = vpop.f32.mrf.mxu0  ;;  %6852 = vmatprep.mubr.msk.f32.mxu1 %vm6974_vm3, %v6973_v13  ;;  %6903 = vmatprep.mubr.msk.f32.mxu0 %vm6974_vm3, %v6973_v13 }
 0x97b   :  { %v4676_v58 = vpop.f32.mrf.mxu1  ;;  %v4805_v59 = vpop.f32.mrf.mxu0 }
 0x97c   :  { %6853 = vmatmul.mubr.msk.f32.gmra.mxu1 %vm4860_vm11, %v4805_v59  ;;  %6904 = vmatmul.mubr.msk.f32.gmra.mxu0 %vm4860_vm11, %v4676_v58 }
 0x97d   :  { %v6774_v60 = vpop.f32.mrf.mxu1  ;;  %v6803_v61 = vpop.f32.mrf.mxu0  ;;  %6855 = vmatprep.mubr.msk.f32.mxu1 %vm6974_vm3, %v6973_v13  ;;  %6906 = vmatprep.mubr.msk.f32.mxu0 %vm6974_vm3, %v6973_v13 }
 0x97f   :  { %v4681_v62 = vpop.f32.mrf.mxu1  ;;  %v4810_v63 = vpop.f32.mrf.mxu0 }
 0x980   :  { %6856 = vmatmul.mubr.msk.f32.gmra.mxu1 %vm4860_vm11, %v4810_v63  ;;  %6907 = vmatmul.mubr.msk.f32.gmra.mxu0 %vm4860_vm11, %v4681_v62 }
 0x981   :  { %v6777_v0 = vpop.f32.mrf.mxu1  ;;  %v6806_v1 = vpop.f32.mrf.mxu0  ;;  %6858 = vmatprep.mubr.msk.f32.mxu1 %vm6974_vm3, %v6973_v13  ;;  %6909 = vmatprep.mubr.msk.f32.mxu0 %vm6974_vm3, %v6973_v13 }
 0x983   :  { %v4686_v2 = vpop.f32.mrf.mxu1  ;;  %v4815_v4 = vpop.f32.mrf.mxu0 }
 0x984   :  { %6859 = vmatmul.mubr.msk.f32.gmra.mxu1 %vm4860_vm11, %v4815_v4  ;;  %6910 = vmatmul.mubr.msk.f32.gmra.mxu0 %vm4860_vm11, %v4686_v2 }
 0x985   :  { %v6780_v7 = vpop.f32.mrf.mxu1  ;;  %v6809_v8 = vpop.f32.mrf.mxu0  ;;  %6861 = vmatprep.mubr.msk.f32.mxu1 %vm6974_vm3, %v6973_v13  ;;  %6912 = vmatprep.mubr.msk.f32.mxu0 %vm6974_vm3, %v6973_v13 }
 0x987   :  { %v4691_v11 = vpop.f32.mrf.mxu1  ;;  %v4820_v12 = vpop.f32.mrf.mxu0 }
 0x988   :  { %6862 = vmatmul.mubr.msk.f32.gmra.mxu1 %vm4860_vm11, %v4820_v12  ;;  %6913 = vmatmul.mubr.msk.f32.gmra.mxu0 %vm4860_vm11, %v4691_v11 }
 0x989   :  { %v6783_v15 = vpop.f32.mrf.mxu1  ;;  %v6812_v16 = vpop.f32.mrf.mxu0  ;;  %6864 = vmatprep.mubr.msk.f32.mxu1 %vm6974_vm3, %v6973_v13  ;;  %6915 = vmatprep.mubr.msk.f32.mxu0 %vm6974_vm3, %v6973_v13 }
 0x98b   :  { %v4696_v17 = vpop.f32.mrf.mxu1  ;;  %v4825_v18 = vpop.f32.mrf.mxu0 }
 0x98c   :  { %6865 = vmatmul.mubr.msk.f32.gmra.mxu1 %vm4860_vm11, %v4825_v18  ;;  %6916 = vmatmul.mubr.msk.f32.gmra.mxu0 %vm4860_vm11, %v4696_v17 }
 0x98d   :  { %v6786_v19 = vpop.f32.mrf.mxu1  ;;  %v6815_v20 = vpop.f32.mrf.mxu0 }
 0xa34   :  { %v4948_v21 = vpop.f32.mrf.mxu1  ;;  %v5069_v22 = vpop.f32.mrf.mxu0 }
 0xa35   :  { %v5070_v24 = vadd.f32 %v5069_v22, %v4948_v21 }
 0xa36   :  { %v6848_v25 = vpop.f32.mrf.mxu1  ;;  %v6899_v26 = vpop.f32.mrf.mxu0 }
 0xa37   :  { %v5110_v27 = vadd.f32 %v5519_v23, %v5070_v24 }
 0xa38   :  { %v4953_v28 = vpop.f32.mrf.mxu1  ;;  %v5074_v13 = vpop.f32.mrf.mxu0 }
 0xa39   :  { %v5520_v29 = vmul.f32 -1.442695, %v5110_v27  ;;  %v5075_v30 = vadd.f32 %v5074_v13, %v4953_v28 }
 0xa3a   :  { %v6851_v31 = vpop.f32.mrf.mxu1  ;;  %v6902_v32 = vpop.f32.mrf.mxu0 }
 0xa3b   :  { %6923 = vpow2.f32 %v5520_v29  ;;  %v5111_v33 = vadd.f32 %v5519_v23, %v5075_v30 }
 0xa3c   :  { %v4958_v34 = vpop.f32.mrf.mxu1  ;;  %v5079_v35 = vpop.f32.mrf.mxu0 }
 0xa3d   :  { %v5521_v36 = vmul.f32 -1.442695, %v5111_v33  ;;  %v5080_v37 = vadd.f32 %v5079_v35, %v4958_v34 }
 0xa3e   :  { %v6854_v38 = vpop.f32.mrf.mxu1  ;;  %v6905_v39 = vpop.f32.mrf.mxu0 }
 0xa3f   :  { %6925 = vpow2.f32 %v5521_v36  ;;  %v5112_v41 = vadd.f32 %v5519_v23, %v5080_v37 }
 0xa40   :  { %v4963_v43 = vpop.f32.mrf.mxu1  ;;  %v5084_v44 = vpop.f32.mrf.mxu0 }
 0xa41   :  { %v5522_v45 = vmul.f32 -1.442695, %v5112_v41  ;;  %v5085_v5 = vadd.f32 %v5084_v44, %v4963_v43 }
 0xa42   :  { %v6857_v9 = vpop.f32.mrf.mxu1  ;;  %v6908_v10 = vpop.f32.mrf.mxu0 }
 0xa43   :  { %6927 = vpow2.f32 %v5522_v45  ;;  %v5113_v14 = vadd.f32 %v5519_v23, %v5085_v5 }
 0xa44   :  { %v4968_v6 = vpop.f32.mrf.mxu1  ;;  %v5089_v3 = vpop.f32.mrf.mxu0 }
 0xa45   :  { %v5523_v40 = vmul.f32 -1.442695, %v5113_v14  ;;  %v5090_v42 = vadd.f32 %v5089_v3, %v4968_v6 }
 0xa46   :  { %v6860_v46 = vpop.f32.mrf.mxu1  ;;  %v6911_v47 = vpop.f32.mrf.mxu0 }
 0xa47   :  { %6929 = vpow2.f32 %v5523_v40  ;;  %v5114_v48 = vadd.f32 %v5519_v23, %v5090_v42 }
 0xa48   :  { %v6924_v49 = vpop.eup %6923  ;;  %v4973_v50 = vpop.f32.mrf.mxu1 }
 0xa49   :  { %v5094_v51 = vpop.f32.mrf.mxu0  ;;  %v5138_v52 = vadd.f32 1.0, %v6924_v49  ;;  %v5524_v53 = vmul.f32 -1.442695, %v5114_v48 }
 0xa4a   :  { %v5095_v54 = vadd.f32 %v5094_v51, %v4973_v50  ;;  %v6863_v55 = vpop.f32.mrf.mxu1 }
 0xa4b   :  { %v6914_v56 = vpop.f32.mrf.mxu0  ;;  %6931 = vrcp.f32 %v5138_v52 }
 0xa4c   :  { %v5115_v57 = vadd.f32 %v5519_v23, %v5095_v54  ;;  %v6926_v58 = vpop.eup %6925  ;;  %6933 = vpow2.f32 %v5524_v53  ;;  %v4978_v59 = vpop.f32.mrf.mxu1 }
 0xa4d   :  { %v5099_v60 = vpop.f32.mrf.mxu0  ;;  %v5139_v61 = vadd.f32 1.0, %v6926_v58 }
 0xa4e   :  { %v5525_v62 = vmul.f32 -1.442695, %v5115_v57  ;;  %v5100_v63 = vadd.f32 %v5099_v60, %v4978_v59  ;;  %v6866_v0 = vpop.f32.mrf.mxu1 }
 0xa4f   :  { %v6917_v1 = vpop.f32.mrf.mxu0  ;;  %6935 = vrcp.f32 %v5139_v61 }
 0xa50   :  { %v5116_v2 = vadd.f32 %v5519_v23, %v5100_v63  ;;  %v6928_v4 = vpop.eup %6927  ;;  %6937 = vpow2.f32 %v5525_v62 }
 0xa51   :  { %v5140_v7 = vadd.f32 1.0, %v6928_v4 }
 0xa52   :  { %v5526_v8 = vmul.f32 -1.442695, %v5116_v2 }
 0xa53   :  { %6939 = vrcp.f32 %v5140_v7 }
 0xa54   :  { %v6930_v11 = vpop.eup %6929  ;;  %6941 = vpow2.f32 %v5526_v8 }
 0xa55   :  { %v5141_v12 = vadd.f32 1.0, %v6930_v11 }
 0xa57   :  { %6943 = vrcp.f32 %v5141_v12 }
 0xa58   :  { %v6932_v15 = vpop.eup %6931 }
 0xa59   :  { %v6934_v16 = vpop.eup %6933  ;;  %5159 = vst.msk [vmem:[#allocation2] sm:$0xff] %vm322_vm2, %v6932_v15 }
 0xa5a   :  { %v5142_v17 = vadd.f32 1.0, %v6934_v16 }
 0xa5c   :  { %v6936_v18 = vpop.eup %6935  ;;  %6945 = vrcp.f32 %v5142_v17 }
 0xa5d   :  { %v6938_v19 = vpop.eup %6937  ;;  %5160 = vst.msk [vmem:[#allocation2 + $0x8] sm:$0xff] %vm322_vm2, %v6936_v18 }
 0xa5e   :  { %v5143_v20 = vadd.f32 1.0, %v6938_v19 }
 0xa60   :  { %v6940_v21 = vpop.eup %6939  ;;  %6947 = vrcp.f32 %v5143_v20 }
 0xa61   :  { %v6942_v22 = vpop.eup %6941  ;;  %5161 = vst.msk [vmem:[#allocation2 + $0x10] sm:$0xff] %vm322_vm2, %v6940_v21 }
 0xa62   :  { %v5144_v23 = vadd.f32 1.0, %v6942_v22 }
 0xa64   :  { %v6944_v24 = vpop.eup %6943  ;;  %6949 = vrcp.f32 %v5144_v23 }
 0xa65   :  { %5162 = vst.msk [vmem:[#allocation2 + $0x18] sm:$0xff] %vm322_vm2, %v6944_v24 }
 0xa69   :  { %v6946_v25 = vpop.eup %6945 }
 0xa6a   :  { %5163 = vst.msk [vmem:[#allocation2 + $0x20] sm:$0xff] %vm322_vm2, %v6946_v25 }
 0xa6d   :  { %v6948_v26 = vpop.eup %6947 }
 0xa6e   :  { %5164 = vst.msk [vmem:[#allocation2 + $0x28] sm:$0xff] %vm322_vm2, %v6948_v26 }
 0xa71   :  { %v6950_v27 = vpop.eup %6949 }
 0xa72   :  { %5165 = vst.msk [vmem:[#allocation2 + $0x30] sm:$0xff] %vm322_vm2, %v6950_v27 }
 0xa73   :  { %6962 = shalt.err (!%p6959_p4)
}
 0xa74   :  { %s6976_s26 = smov 128   ;;  %s6977_s27 = smov 8  }
 0xa75   :  { %5177 = dma.vmem_to_hbm [thread:$0]  %s5172_s2, 896, %s8790_s16, [#allocation3], %s6976_s26, %s6976_s26, %s6977_s27  }
 0xa76   :  { %6971 = dma.done.wait [#allocation3], 896  }
 0xa77   :  { %6972 = vsyncadd [#allocation3], 4294966400 }
 0xa78   :  { %5181 = vsyncpa [#allocation3], 1 }

</bundles_post_ra>
